<compile_context>
chip_gen: v7x
topology: tpu7x:2x2x1
jax: 0.10.0
libtpu: 0.0.40
codegen_flags: <defaults>
</compile_context>

<pallas_src>
import jax
import jax.numpy as jnp
from jax.experimental import pallas as pl
from jax.experimental.pallas import tpu as pltpu


def _make_grammar_kernel(L, T, N, Bt):
    NN = N * N

    def kernel(xf_ref, w_ref, out_ref, res_ref):
        # xf_ref : (T, L*Bt)    fused MXU RHS; lane index = i*Bt + b (batch on lanes)
        # w_ref  : (N+NN, T)    raw stacked [terminal; nonterminal] parameters
        # out_ref: (1, Bt)      lane-dense output slab
        # res_ref: (N+NN, L*Bt) VMEM scratch holding the fused matmul result
        w_s = jax.nn.sigmoid(w_ref[...].astype(jnp.float32))            # (N+NN, T)

        # One fused MXU matmul: every per-step T-contraction at once
        # (single weight push instead of L tiny K=8 dots).
        res_ref[...] = jnp.dot(
            w_s, xf_ref[...].astype(jnp.float32),
            preferred_element_type=jnp.float32)                          # (N+NN, L*Bt)

        # Step 0: prev[n, b] = sum_t sigmoid(Wt)[n, t] * x[b, 0, t]
        prev = res_ref[0:N, 0:Bt]                                        # (N, Bt)
        out_prev = prev[0:1, :]                                          # (1, Bt)

        # Recurrence over sequence positions (L static -> unrolled); each step
        # consumes one 128-aligned lane block of the fused result from VMEM.
        for i in range(1, L):
            m_i = jnp.clip(res_ref[N:, i * Bt:(i + 1) * Bt], 0.0, 1.0)   # (NN, Bt)
            m_i = m_i.reshape(N, N, Bt)                                  # [n, m, b]
            # cur[n, b] = sum_m m_i[n, m, b] * prev[m, b]  (UN-clamped carried fwd)
            cur = jnp.sum(m_i * prev[None, :, :], axis=1)                # (N, Bt)
            cur_cl = jnp.clip(cur, 0.0, 1.0)
            # Carry-over mask row x[b, i, T-1], loaded lazily from VMEM.
            mask = xf_ref[T - 1:T, i * Bt:(i + 1) * Bt].astype(jnp.float32)  # (1, Bt)
            out_prev = out_prev * mask + cur_cl[0:1, :] * (1.0 - mask)
            prev = cur

        out_ref[...] = out_prev.astype(out_ref.dtype)

    return kernel


def _auto_batch_tile(Bp):
    # >= 2 grid steps when the batch allows it (v7x: 2 TensorCores), otherwise
    # the largest lane-dense tile (v5e/v6e: the grid is a serial loop).
    if Bp <= 128:
        return 128
    half = (Bp // 2) // 128 * 128
    return int(max(128, min(256, half)))


def grammar_forward(x, wt, wn, *, batch_tile=None):
    """x: (B, L, T), wt: (N, T), wn: (N, N, T)  ->  (B, 1)"""
    B, L, T = x.shape
    N = wt.shape[0]
    x = x.astype(jnp.float32)

    if batch_tile is None:
        batch_tile = _auto_batch_tile(((B + 127) // 128) * 128)
    Bp = ((B + batch_tile - 1) // batch_tile) * batch_tile
    if Bp != B:
        x = jnp.pad(x, ((0, Bp - B), (0, 0), (0, 0)))
    G = Bp // batch_tile

    # Wrapper-side layout plumbing only (no compute hoisted out of the kernel):
    #   xf[t, (g*L + i)*Bt + b] = x[g*Bt + b, i, t]   -> fused MXU RHS, batch on lanes
    #   w_stack = [Wt ; Wn.reshape(N*N, T)]           -> raw params, sigmoid in-kernel
    xf = jnp.transpose(x.reshape(G, batch_tile, L, T), (3, 0, 2, 1))
    xf = xf.reshape(T, G * L * batch_tile)
    w_stack = jnp.concatenate(
        [wt.astype(jnp.float32), wn.astype(jnp.float32).reshape(N * N, T)], axis=0)

    kernel = _make_grammar_kernel(L, T, N, batch_tile)
    out = pl.pallas_call(
        kernel,
        out_shape=jax.ShapeDtypeStruct((1, Bp), jnp.float32),
        grid_spec=pltpu.PrefetchScalarGridSpec(
            num_scalar_prefetch=0,
            grid=(G,),
            in_specs=[
                pl.BlockSpec((T, L * batch_tile), lambda g: (0, g)),
                pl.BlockSpec((N + N * N, T), lambda g: (0, 0)),
            ],
            out_specs=pl.BlockSpec((1, batch_tile), lambda g: (0, g)),
            scratch_shapes=[pltpu.VMEM((N + N * N, L * batch_tile), jnp.float32)],
        ),
        compiler_params=pltpu.CompilerParams(
            dimension_semantics=("parallel",)),
    )(xf, w_stack)

    return out.reshape(Bp, 1)[:B]


def grammar_reference(x, wt, wn):
    """Pure-JAX reference matching the torch forward exactly."""
    B, L, T = x.shape
    wt_s = jax.nn.sigmoid(wt)
    wn_s = jax.nn.sigmoid(wn)
    prev = x[:, 0, :] @ wt_s.T                               # (B, N)
    out_prev = prev[:, 0]
    for i in range(1, L):
        xi = x[:, i, :]
        m = jnp.clip(jnp.einsum('nmt,bt->bnm', wn_s, xi), 0.0, 1.0)
        cur = jnp.einsum('bnm,bm->bn', m, prev)
        cur_cl = jnp.clip(cur, 0.0, 1.0)
        mask = xi[:, T - 1]
        out_prev = out_prev * mask + cur_cl[:, 0] * (1.0 - mask)
        prev = cur                                           # un-clamped carried forward
    return out_prev[:, None]


if __name__ == "__main__":
    # Shapes consistent with the module: input_length L = 8, n_terminals T = 8,
    # n_nonterminals N = 8.  Batch = 256 -> two 128-wide lane tiles (parallel
    # grid axis; both v7x TensorCores get a tile).
    B, L, T, N = 256, 8, 8, 8

    key = jax.random.PRNGKey(0)
    k_wt, k_wn, k_x = jax.random.split(key, 3)

    wt = jax.random.normal(k_wt, (N, T), dtype=jnp.float32)      # terminal_productions
    wn = jax.random.normal(k_wn, (N, N, T), dtype=jnp.float32)   # nonterminal_productions
    x = jax.random.uniform(k_x, (B, L, T), dtype=jnp.float32)    # (B, L, T) in [0, 1)

    out = jax.block_until_ready(grammar_forward(x, wt, wn))
    ref = grammar_reference(x, wt, wn)

    assert out.shape == (B, 1), out.shape
    assert jnp.allclose(out, ref, atol=1e-5, rtol=1e-5), (out, ref)

    print("KERNEL_OK")
</pallas_src>

<mosaic_0001>
module attributes {stable_mosaic.version = 11 : i64} {
  func.func @kernel(%arg0: i32, %arg1: memref<8x1024xf32, #tpu.memory_space<vmem>>, %arg2: memref<72x8xf32, #tpu.memory_space<vmem>>, %arg3: memref<1x128xf32, #tpu.memory_space<vmem>>, %arg4: memref<72x1024xf32, #tpu.memory_space<vmem>>) attributes {dimension_semantics = [#tpu.dimension_semantics<parallel>], iteration_bounds = array<i64: 2>, scalar_prefetch = 0 : i64, scratch_operands = 1 : i64, tpu.core_type = #tpu.core_type<tc>, window_params = [{transform_indices = @transform_0, window_bounds = array<i64: 8, 1024>}, {pipeline_mode = #tpu.pipeline_mode<synchronous>, transform_indices = @transform_1, window_bounds = array<i64: 72, 8>}, {transform_indices = @transform_2, window_bounds = array<i64: 1, 128>}]} {
    %c0 = arith.constant 0 : index
    %c0_0 = arith.constant 0 : index
    %0 = vector.load %arg2[%c0, %c0_0] : memref<72x8xf32, #tpu.memory_space<vmem>>, vector<72x8xf32>
    %1 = arith.negf %0 : vector<72x8xf32>
    %2 = math.exp %1 : vector<72x8xf32>
    %cst = arith.constant 1.000000e+00 : f32
    %3 = vector.broadcast %cst : f32 to vector<72x8xf32>
    %4 = arith.addf %3, %2 : vector<72x8xf32>
    %5 = arith.divf %3, %4 : vector<72x8xf32>
    %c0_1 = arith.constant 0 : index
    %c0_2 = arith.constant 0 : index
    %6 = vector.load %arg1[%c0_1, %c0_2] : memref<8x1024xf32, #tpu.memory_space<vmem>>, vector<8x1024xf32>
    %cst_3 = arith.constant dense<0.000000e+00> : vector<72x1024xf32>
    %7 = tpu.matmul %5, %6, %cst_3 {dimension_numbers = #tpu.dot_dimension_numbers<[1], [0], [0], [1], [0, 0, 1, 1], [], []>} : vector<72x8xf32>, vector<8x1024xf32>, vector<72x1024xf32> -> vector<72x1024xf32>
    %c0_4 = arith.constant 0 : index
    %c0_5 = arith.constant 0 : index
    %8 = vector.load %arg4[%c0_4, %c0_5] : memref<72x1024xf32, #tpu.memory_space<vmem>>, vector<72x1024xf32>
    tpu.vector_store %arg4[%c0_4, %c0_5], %7 {strides = array<i32>} : memref<72x1024xf32, #tpu.memory_space<vmem>>, vector<72x1024xf32>,
    %c0_6 = arith.constant 0 : index
    %c0_7 = arith.constant 0 : index
    %9 = vector.load %arg4[%c0_6, %c0_7] : memref<72x1024xf32, #tpu.memory_space<vmem>>, vector<8x128xf32>
    %10 = vector.extract_strided_slice %9 {offsets = [0, 0], sizes = [1, 128], strides = [1, 1]} : vector<8x128xf32> to vector<1x128xf32>
    %c8 = arith.constant 8 : index
    %c128 = arith.constant 128 : index
    %11 = vector.load %arg4[%c8, %c128] : memref<72x1024xf32, #tpu.memory_space<vmem>>, vector<64x128xf32>
    %cst_8 = arith.constant 0.000000e+00 : f32
    %cst_9 = arith.constant 1.000000e+00 : f32
    %12 = vector.broadcast %cst_8 : f32 to vector<64x128xf32>
    %13 = arith.maximumf %12, %11 : vector<64x128xf32>
    %14 = vector.broadcast %cst_9 : f32 to vector<64x128xf32>
    %15 = arith.minimumf %14, %13 : vector<64x128xf32>
    %16 = vector.shape_cast %15 : vector<64x128xf32> to vector<8x8x128xf32>
    %17 = vector.shape_cast %9 : vector<8x128xf32> to vector<1x8x128xf32>
    %18 = vector.broadcast %17 : vector<1x8x128xf32> to vector<8x8x128xf32>
    %19 = arith.mulf %16, %18 : vector<8x8x128xf32>
    %cst_10 = arith.constant dense<0.000000e+00> : vector<8x128xf32>
    %20 = vector.multi_reduction <add>, %19, %cst_10 [1] : vector<8x8x128xf32> to vector<8x128xf32>
    %cst_11 = arith.constant 0.000000e+00 : f32
    %cst_12 = arith.constant 1.000000e+00 : f32
    %21 = vector.broadcast %cst_11 : f32 to vector<8x128xf32>
    %22 = arith.maximumf %21, %20 : vector<8x128xf32>
    %23 = vector.broadcast %cst_12 : f32 to vector<8x128xf32>
    %24 = arith.minimumf %23, %22 : vector<8x128xf32>
    %c7 = arith.constant 7 : index
    %c128_13 = arith.constant 128 : index
    %25 = vector.load %arg1[%c7, %c128_13] : memref<8x1024xf32, #tpu.memory_space<vmem>>, vector<1x128xf32>
    %26 = arith.mulf %10, %25 : vector<1x128xf32>
    %27 = vector.extract_strided_slice %24 {offsets = [0, 0], sizes = [1, 128], strides = [1, 1]} : vector<8x128xf32> to vector<1x128xf32>
    %cst_14 = arith.constant 1.000000e+00 : f32
    %28 = vector.broadcast %cst_14 : f32 to vector<1x128xf32>
    %29 = arith.subf %28, %25 : vector<1x128xf32>
    %30 = arith.mulf %27, %29 : vector<1x128xf32>
    %31 = arith.addf %26, %30 : vector<1x128xf32>
    %c8_15 = arith.constant 8 : index
    %c256 = arith.constant 256 : index
    %32 = vector.load %arg4[%c8_15, %c256] : memref<72x1024xf32, #tpu.memory_space<vmem>>, vector<64x128xf32>
    %cst_16 = arith.constant 0.000000e+00 : f32
    %cst_17 = arith.constant 1.000000e+00 : f32
    %33 = vector.broadcast %cst_16 : f32 to vector<64x128xf32>
    %34 = arith.maximumf %33, %32 : vector<64x128xf32>
    %35 = vector.broadcast %cst_17 : f32 to vector<64x128xf32>
    %36 = arith.minimumf %35, %34 : vector<64x128xf32>
    %37 = vector.shape_cast %36 : vector<64x128xf32> to vector<8x8x128xf32>
    %38 = vector.shape_cast %20 : vector<8x128xf32> to vector<1x8x128xf32>
    %39 = vector.broadcast %38 : vector<1x8x128xf32> to vector<8x8x128xf32>
    %40 = arith.mulf %37, %39 : vector<8x8x128xf32>
    %cst_18 = arith.constant dense<0.000000e+00> : vector<8x128xf32>
    %41 = vector.multi_reduction <add>, %40, %cst_18 [1] : vector<8x8x128xf32> to vector<8x128xf32>
    %cst_19 = arith.constant 0.000000e+00 : f32
    %cst_20 = arith.constant 1.000000e+00 : f32
    %42 = vector.broadcast %cst_19 : f32 to vector<8x128xf32>
    %43 = arith.maximumf %42, %41 : vector<8x128xf32>
    %44 = vector.broadcast %cst_20 : f32 to vector<8x128xf32>
    %45 = arith.minimumf %44, %43 : vector<8x128xf32>
    %c7_21 = arith.constant 7 : index
    %c256_22 = arith.constant 256 : index
    %46 = vector.load %arg1[%c7_21, %c256_22] : memref<8x1024xf32, #tpu.memory_space<vmem>>, vector<1x128xf32>
    %47 = arith.mulf %31, %46 : vector<1x128xf32>
    %48 = vector.extract_strided_slice %45 {offsets = [0, 0], sizes = [1, 128], strides = [1, 1]} : vector<8x128xf32> to vector<1x128xf32>
    %cst_23 = arith.constant 1.000000e+00 : f32
    %49 = vector.broadcast %cst_23 : f32 to vector<1x128xf32>
    %50 = arith.subf %49, %46 : vector<1x128xf32>
    %51 = arith.mulf %48, %50 : vector<1x128xf32>
    %52 = arith.addf %47, %51 : vector<1x128xf32>
    %c8_24 = arith.constant 8 : index
    %c384 = arith.constant 384 : index
    %53 = vector.load %arg4[%c8_24, %c384] : memref<72x1024xf32, #tpu.memory_space<vmem>>, vector<64x128xf32>
    %cst_25 = arith.constant 0.000000e+00 : f32
    %cst_26 = arith.constant 1.000000e+00 : f32
    %54 = vector.broadcast %cst_25 : f32 to vector<64x128xf32>
    %55 = arith.maximumf %54, %53 : vector<64x128xf32>
    %56 = vector.broadcast %cst_26 : f32 to vector<64x128xf32>
    %57 = arith.minimumf %56, %55 : vector<64x128xf32>
    %58 = vector.shape_cast %57 : vector<64x128xf32> to vector<8x8x128xf32>
    %59 = vector.shape_cast %41 : vector<8x128xf32> to vector<1x8x128xf32>
    %60 = vector.broadcast %59 : vector<1x8x128xf32> to vector<8x8x128xf32>
    %61 = arith.mulf %58, %60 : vector<8x8x128xf32>
    %cst_27 = arith.constant dense<0.000000e+00> : vector<8x128xf32>
    %62 = vector.multi_reduction <add>, %61, %cst_27 [1] : vector<8x8x128xf32> to vector<8x128xf32>
    %cst_28 = arith.constant 0.000000e+00 : f32
    %cst_29 = arith.constant 1.000000e+00 : f32
    %63 = vector.broadcast %cst_28 : f32 to vector<8x128xf32>
    %64 = arith.maximumf %63, %62 : vector<8x128xf32>
    %65 = vector.broadcast %cst_29 : f32 to vector<8x128xf32>
    %66 = arith.minimumf %65, %64 : vector<8x128xf32>
    %c7_30 = arith.constant 7 : index
    %c384_31 = arith.constant 384 : index
    %67 = vector.load %arg1[%c7_30, %c384_31] : memref<8x1024xf32, #tpu.memory_space<vmem>>, vector<1x128xf32>
    %68 = arith.mulf %52, %67 : vector<1x128xf32>
    %69 = vector.extract_strided_slice %66 {offsets = [0, 0], sizes = [1, 128], strides = [1, 1]} : vector<8x128xf32> to vector<1x128xf32>
    %cst_32 = arith.constant 1.000000e+00 : f32
    %70 = vector.broadcast %cst_32 : f32 to vector<1x128xf32>
    %71 = arith.subf %70, %67 : vector<1x128xf32>
    %72 = arith.mulf %69, %71 : vector<1x128xf32>
    %73 = arith.addf %68, %72 : vector<1x128xf32>
    %c8_33 = arith.constant 8 : index
    %c512 = arith.constant 512 : index
    %74 = vector.load %arg4[%c8_33, %c512] : memref<72x1024xf32, #tpu.memory_space<vmem>>, vector<64x128xf32>
    %cst_34 = arith.constant 0.000000e+00 : f32
    %cst_35 = arith.constant 1.000000e+00 : f32
    %75 = vector.broadcast %cst_34 : f32 to vector<64x128xf32>
    %76 = arith.maximumf %75, %74 : vector<64x128xf32>
    %77 = vector.broadcast %cst_35 : f32 to vector<64x128xf32>
    %78 = arith.minimumf %77, %76 : vector<64x128xf32>
    %79 = vector.shape_cast %78 : vector<64x128xf32> to vector<8x8x128xf32>
    %80 = vector.shape_cast %62 : vector<8x128xf32> to vector<1x8x128xf32>
    %81 = vector.broadcast %80 : vector<1x8x128xf32> to vector<8x8x128xf32>
    %82 = arith.mulf %79, %81 : vector<8x8x128xf32>
    %cst_36 = arith.constant dense<0.000000e+00> : vector<8x128xf32>
    %83 = vector.multi_reduction <add>, %82, %cst_36 [1] : vector<8x8x128xf32> to vector<8x128xf32>
    %cst_37 = arith.constant 0.000000e+00 : f32
    %cst_38 = arith.constant 1.000000e+00 : f32
    %84 = vector.broadcast %cst_37 : f32 to vector<8x128xf32>
    %85 = arith.maximumf %84, %83 : vector<8x128xf32>
    %86 = vector.broadcast %cst_38 : f32 to vector<8x128xf32>
    %87 = arith.minimumf %86, %85 : vector<8x128xf32>
    %c7_39 = arith.constant 7 : index
    %c512_40 = arith.constant 512 : index
    %88 = vector.load %arg1[%c7_39, %c512_40] : memref<8x1024xf32, #tpu.memory_space<vmem>>, vector<1x128xf32>
    %89 = arith.mulf %73, %88 : vector<1x128xf32>
    %90 = vector.extract_strided_slice %87 {offsets = [0, 0], sizes = [1, 128], strides = [1, 1]} : vector<8x128xf32> to vector<1x128xf32>
    %cst_41 = arith.constant 1.000000e+00 : f32
    %91 = vector.broadcast %cst_41 : f32 to vector<1x128xf32>
    %92 = arith.subf %91, %88 : vector<1x128xf32>
    %93 = arith.mulf %90, %92 : vector<1x128xf32>
    %94 = arith.addf %89, %93 : vector<1x128xf32>
    %c8_42 = arith.constant 8 : index
    %c640 = arith.constant 640 : index
    %95 = vector.load %arg4[%c8_42, %c640] : memref<72x1024xf32, #tpu.memory_space<vmem>>, vector<64x128xf32>
    %cst_43 = arith.constant 0.000000e+00 : f32
    %cst_44 = arith.constant 1.000000e+00 : f32
    %96 = vector.broadcast %cst_43 : f32 to vector<64x128xf32>
    %97 = arith.maximumf %96, %95 : vector<64x128xf32>
    %98 = vector.broadcast %cst_44 : f32 to vector<64x128xf32>
    %99 = arith.minimumf %98, %97 : vector<64x128xf32>
    %100 = vector.shape_cast %99 : vector<64x128xf32> to vector<8x8x128xf32>
    %101 = vector.shape_cast %83 : vector<8x128xf32> to vector<1x8x128xf32>
    %102 = vector.broadcast %101 : vector<1x8x128xf32> to vector<8x8x128xf32>
    %103 = arith.mulf %100, %102 : vector<8x8x128xf32>
    %cst_45 = arith.constant dense<0.000000e+00> : vector<8x128xf32>
    %104 = vector.multi_reduction <add>, %103, %cst_45 [1] : vector<8x8x128xf32> to vector<8x128xf32>
    %cst_46 = arith.constant 0.000000e+00 : f32
    %cst_47 = arith.constant 1.000000e+00 : f32
    %105 = vector.broadcast %cst_46 : f32 to vector<8x128xf32>
    %106 = arith.maximumf %105, %104 : vector<8x128xf32>
    %107 = vector.broadcast %cst_47 : f32 to vector<8x128xf32>
    %108 = arith.minimumf %107, %106 : vector<8x128xf32>
    %c7_48 = arith.constant 7 : index
    %c640_49 = arith.constant 640 : index
    %109 = vector.load %arg1[%c7_48, %c640_49] : memref<8x1024xf32, #tpu.memory_space<vmem>>, vector<1x128xf32>
    %110 = arith.mulf %94, %109 : vector<1x128xf32>
    %111 = vector.extract_strided_slice %108 {offsets = [0, 0], sizes = [1, 128], strides = [1, 1]} : vector<8x128xf32> to vector<1x128xf32>
    %cst_50 = arith.constant 1.000000e+00 : f32
    %112 = vector.broadcast %cst_50 : f32 to vector<1x128xf32>
    %113 = arith.subf %112, %109 : vector<1x128xf32>
    %114 = arith.mulf %111, %113 : vector<1x128xf32>
    %115 = arith.addf %110, %114 : vector<1x128xf32>
    %c8_51 = arith.constant 8 : index
    %c768 = arith.constant 768 : index
    %116 = vector.load %arg4[%c8_51, %c768] : memref<72x1024xf32, #tpu.memory_space<vmem>>, vector<64x128xf32>
    %cst_52 = arith.constant 0.000000e+00 : f32
    %cst_53 = arith.constant 1.000000e+00 : f32
    %117 = vector.broadcast %cst_52 : f32 to vector<64x128xf32>
    %118 = arith.maximumf %117, %116 : vector<64x128xf32>
    %119 = vector.broadcast %cst_53 : f32 to vector<64x128xf32>
    %120 = arith.minimumf %119, %118 : vector<64x128xf32>
    %121 = vector.shape_cast %120 : vector<64x128xf32> to vector<8x8x128xf32>
    %122 = vector.shape_cast %104 : vector<8x128xf32> to vector<1x8x128xf32>
    %123 = vector.broadcast %122 : vector<1x8x128xf32> to vector<8x8x128xf32>
    %124 = arith.mulf %121, %123 : vector<8x8x128xf32>
    %cst_54 = arith.constant dense<0.000000e+00> : vector<8x128xf32>
    %125 = vector.multi_reduction <add>, %124, %cst_54 [1] : vector<8x8x128xf32> to vector<8x128xf32>
    %cst_55 = arith.constant 0.000000e+00 : f32
    %cst_56 = arith.constant 1.000000e+00 : f32
    %126 = vector.broadcast %cst_55 : f32 to vector<8x128xf32>
    %127 = arith.maximumf %126, %125 : vector<8x128xf32>
    %128 = vector.broadcast %cst_56 : f32 to vector<8x128xf32>
    %129 = arith.minimumf %128, %127 : vector<8x128xf32>
    %c7_57 = arith.constant 7 : index
    %c768_58 = arith.constant 768 : index
    %130 = vector.load %arg1[%c7_57, %c768_58] : memref<8x1024xf32, #tpu.memory_space<vmem>>, vector<1x128xf32>
    %131 = arith.mulf %115, %130 : vector<1x128xf32>
    %132 = vector.extract_strided_slice %129 {offsets = [0, 0], sizes = [1, 128], strides = [1, 1]} : vector<8x128xf32> to vector<1x128xf32>
    %cst_59 = arith.constant 1.000000e+00 : f32
    %133 = vector.broadcast %cst_59 : f32 to vector<1x128xf32>
    %134 = arith.subf %133, %130 : vector<1x128xf32>
    %135 = arith.mulf %132, %134 : vector<1x128xf32>
    %136 = arith.addf %131, %135 : vector<1x128xf32>
    %c8_60 = arith.constant 8 : index
    %c896 = arith.constant 896 : index
    %137 = vector.load %arg4[%c8_60, %c896] : memref<72x1024xf32, #tpu.memory_space<vmem>>, vector<64x128xf32>
    %cst_61 = arith.constant 0.000000e+00 : f32
    %cst_62 = arith.constant 1.000000e+00 : f32
    %138 = vector.broadcast %cst_61 : f32 to vector<64x128xf32>
    %139 = arith.maximumf %138, %137 : vector<64x128xf32>
    %140 = vector.broadcast %cst_62 : f32 to vector<64x128xf32>
    %141 = arith.minimumf %140, %139 : vector<64x128xf32>
    %142 = vector.shape_cast %141 : vector<64x128xf32> to vector<8x8x128xf32>
    %143 = vector.shape_cast %125 : vector<8x128xf32> to vector<1x8x128xf32>
    %144 = vector.broadcast %143 : vector<1x8x128xf32> to vector<8x8x128xf32>
    %145 = arith.mulf %142, %144 : vector<8x8x128xf32>
    %cst_63 = arith.constant dense<0.000000e+00> : vector<8x128xf32>
    %146 = vector.multi_reduction <add>, %145, %cst_63 [1] : vector<8x8x128xf32> to vector<8x128xf32>
    %cst_64 = arith.constant 0.000000e+00 : f32
    %cst_65 = arith.constant 1.000000e+00 : f32
    %147 = vector.broadcast %cst_64 : f32 to vector<8x128xf32>
    %148 = arith.maximumf %147, %146 : vector<8x128xf32>
    %149 = vector.broadcast %cst_65 : f32 to vector<8x128xf32>
    %150 = arith.minimumf %149, %148 : vector<8x128xf32>
    %c7_66 = arith.constant 7 : index
    %c896_67 = arith.constant 896 : index
    %151 = vector.load %arg1[%c7_66, %c896_67] : memref<8x1024xf32, #tpu.memory_space<vmem>>, vector<1x128xf32>
    %152 = arith.mulf %136, %151 : vector<1x128xf32>
    %153 = vector.extract_strided_slice %150 {offsets = [0, 0], sizes = [1, 128], strides = [1, 1]} : vector<8x128xf32> to vector<1x128xf32>
    %cst_68 = arith.constant 1.000000e+00 : f32
    %154 = vector.broadcast %cst_68 : f32 to vector<1x128xf32>
    %155 = arith.subf %154, %151 : vector<1x128xf32>
    %156 = arith.mulf %153, %155 : vector<1x128xf32>
    %157 = arith.addf %152, %156 : vector<1x128xf32>
    %c0_69 = arith.constant 0 : index
    %c0_70 = arith.constant 0 : index
    %158 = vector.load %arg3[%c0_69, %c0_70] : memref<1x128xf32, #tpu.memory_space<vmem>>, vector<1x128xf32>
    tpu.vector_store %arg3[%c0_69, %c0_70], %157 {strides = array<i32>} : memref<1x128xf32, #tpu.memory_space<vmem>>, vector<1x128xf32>,
    return
  }
  func.func @transform_0(%arg0: i32) -> (i32, i32) {
    %c0_i32 = arith.constant 0 : i32
    %c0_i32_0 = arith.constant 0 : i32
    return %c0_i32, %arg0 : i32, i32
  }
  func.func @transform_1(%arg0: i32) -> (i32, i32) {
    %c0_i32 = arith.constant 0 : i32
    %c0_i32_0 = arith.constant 0 : i32
    %c0_i32_1 = arith.constant 0 : i32
    return %c0_i32, %c0_i32_0 : i32, i32
  }
  func.func @transform_2(%arg0: i32) -> (i32, i32) {
    %c0_i32 = arith.constant 0 : i32
    %c0_i32_0 = arith.constant 0 : i32
    return %c0_i32, %arg0 : i32, i32
  }
}

</mosaic_0001>

<bundles_post_ra>
// kernel: tpu_custom_call.1
= control target key start
LH: loop header
LB: loop body
LE: loop exit
PB: predicated region body
PF: predicated region fallthrough
CT: control target
= control target key end

     0   :  { %7 = vsyncpa [#allocation4], 0  ;;  %s2289_s0 = inlined_call_operand.hbm [shape: f32[8,2048], index: 0, kind: input, shape index: {}]   ;;  %s2290_s1 = inlined_call_operand.vmem [shape: f32[72,8], index: 1, kind: input, shape index: {}]   ;;  %s2291_s2 = inlined_call_operand.hbm [shape: f32[1,256], index: 2, kind: output, shape index: {}]  }
   0x1   :  { %9 = vsyncpa [#allocation4 + $0x1], 0 }
   0x2   :  { %10 = vsyncpa [#allocation5], 0 }
   0x3   :  { %12 = vsyncpa [#allocation5 + $0x1], 0  ;;  %s1786_s9 = smov 0   ;;  %s1788_s10 = smov 0  }
   0x4   :  { %s1790_s11 = smov 0   ;;  %s1792_s12 = smov 0  }
   0x5 LB: > { %s1807_s13 = sadd.s32 4294967295, %s1766_s12   ;;  %s1530_s14 = sadd.s32 4294967294, %s1766_s12   ;;  %s1766_s12 = sphi %s1792_s12, %s2307_s12   ;;  %s1762_s11 = sphi %s1790_s11, %s2306_s11   ;;  %s1758_s10 = sphi %s1788_s10, %s2305_s10   ;;  %s1754_s9 = sphi %s1786_s9, %s2304_s9  }
   0x6   : > { %s1811_s15 = sadd.s32 1, %s1766_s12   ;;  %s25_s16 = sadd.s32 1, %s1762_s11 }
   0x7   : > { %s22_s17 = ssub.s32 %s1766_s12, %s1811_s15  ;;  %p32_p0 = scmp.ne.s32.totalorder %s1762_s11, %s1758_s10 }
   0x8   : > { %p23_p1 = scmp.eq.s32.totalorder %s22_s17, 0  ;;  %p33_p2 = scmp.eq.s32.totalorder %s1766_s12, 0 }
   0x9   : > { %p38_p3 = scmp.ne.s32.totalorder %s1758_s10, %s1754_s9  ;;  %p39_p4 = scmp.eq.s32.totalorder %s1807_s13, 0 }
   0xa   : > { %s1823_s18 = scalar_select %p23_p1, %s1762_s11, %s25_s16  }
   0xb   : > { %p1825_p5 = por %p33_p2, %p32_p0  ;;  %p1829_p6 = por %p39_p4, %p38_p3 }
   0xc   : > { %p83_p7 = scmp.eq.s32.totalorder %s1807_s13, 1  ;;  %p89_p8 = scmp.eq.s32.totalorder %s1530_s14, 1 }
   0xd   : > { %p1599_p10 = scmp.lt.s32.totalorder %s1766_s12, 2  ;;  %s112_s23 = sand.u32 1, %s1762_s11  }
   0xe   : > { %p1836_p11 = por %p83_p7, %p32_p0  ;;  %p1840_p12 = por %p89_p8, %p38_p3 }
   0xf   : > { %s1586_s24 = sshll.u32 %s1766_s12, 10  ;;  %s1533_s25 = sshll.u32 %s112_s23, 6 }
  0x10   : > { %s2295_s21 = scalar_select %p1836_p11, 1, 0 }
  0x11   : > { %s2296_s22 = scalar_select %p1840_p12, 1, 0 }
  0x12   : > { %s1849_s28 = scalar_lea.hbm %s2289_s0, %s1586_s24  ;;  %s116_s29 = scalar_lea.vmem [#allocation3], %s1533_s25 }
  0x13   : > { %s124_s30 = sshll.u32 %s116_s29, 4  ;;  %p1853_p13 = pnand %p1599_p10, %p1825_p5  ;;  %s1857_s30 = int_to_ptr.vmem [resolvable:$true] %s124_s30 }
  0x14   : > { %s113_s4 = scalar_lea.sflag [#allocation4], %s112_s23  ;;  %s1670_s5 = scalar_lea.hbm %s1849_s28, 1024 }
  0x15   : > { %p1671_p2 = scmp.ne.s32.totalorder %s1849_s28, %s1670_s5  ;;  %p1672_p3 = pneg %p1853_p13 }
  0x16   : > { %s1675_s8 = scalar_lea.hbm %s2289_s0, 2048  ;;  %p1676_p5 = scmp.lt.u32.totalorder %s1849_s28, %s2289_s0 }
  0x17   : > { %p1673_p4 = pnand %p1672_p3, %p1671_p2  ;;  %p1677_p8 = scmp.lt.u32.totalorder %s1675_s8, %s1670_s5 }
  0x18   : > { %p1679_p9 = scmp.lt.u32.totalorder %s1670_s5, %s1849_s28 }
  0x19   : > { %p1674_p7 = pneg %p1673_p4  ;;  %p1678_p10 = por %p1677_p8, %p1676_p5 }
  0x1b   : > { %p1680_p0 = por %p1679_p9, %p1678_p10 }
  0x1d   : > { %p1681_p1 = pnand %p1680_p0, %p1674_p7 }
  0x1f   : > { %1684 = shalt.err (!%p1681_p1)
}
  0x20   : > { %s1685_s17 = scalar_lea.vmem %s1857_s30, 1024  ;;  %s1768_s19 = smov [#allocation3]  }
  0x21   : > { %p1686_p2 = scmp.ne.s32.totalorder %s1857_s30, %s1685_s17  ;;  %s1690_s23 = sshll.u32 %s1768_s19, 4  ;;  %s1691_s23 = int_to_ptr.vmem [resolvable:$false] %s1690_s23 }
  0x22   : > { %s1692_s24 = scalar_lea.vmem %s1691_s23, 2048  ;;  %p1693_p11 = scmp.lt.s32.totalorder %s1857_s30, %s1691_s23 }
  0x23   : > { %p1688_p4 = pnand %p1686_p2, %p1672_p3  ;;  %p1694_p5 = scmp.lt.s32.totalorder %s1692_s24, %s1685_s17 }
  0x25   : > { %p1689_p12 = pneg %p1688_p4  ;;  %p1695_p8 = por %p1694_p5, %p1693_p11 }
  0x27   : > { %p1696_p9 = pnand %p1695_p8, %p1689_p12 }
  0x29   : > { %1699 = shalt.err (!%p1696_p9)
}
  0x2a   : > { %1594 = dma.hbm_to_vmem [thread:$0]  (!%p1853_p13), %s1849_s28, 1024, %s1857_s30, %s113_s4  }
  0x2b   : > { %p2298_p0 = scmp.lt.s32.totalorder %s1766_s12, 3  ;;  %p2299_p1 = scmp.ge.s32.totalorder %s1766_s12, 1 }
  0x2d   : > { %p130_p3 = pnand %p2299_p1, %p2298_p0 }
  0x2e   : > { %s1891_s25 = sand.u32 (!%p130_p3), 1, %s1758_s10  }
  0x2f   : > { %133 = sbr.rel (%p130_p3) target bundleno = 488 (0x1e8), region = 28  ;;  %s1537_s26 = sshll.u32 (!%p130_p3), %s1891_s25, 6 }
  0x30   : > { %s136_s27 = scalar_lea.sflag (!%p130_p3), [#allocation4], %s1891_s25  ;;  %s1895_s29 = scalar_lea.vmem (!%p130_p3), [#allocation3], %s1537_s26 }
  0x36   : > { %1745 = dma.done.wait (%p1829_p6), %s136_s27, 1024  }
  0x37   : > { %1747 = vsyncadd (%p1829_p6), %s136_s27, 4294966272  ;;  %v1769_v0 = vmov 0.0   ;;  %v224_v1 = vld [vmem:[%s1895_s29 + $0x8] sm:$0xff]  ;;  %v223_v2 = vld [vmem:[%s1895_s29] sm:$0xff]  ;;  %vm231_vm0 = vcmask 64512   ;;  %vm927_vm1 = vcmask 1041409  }
  0x38   : > { %323 = vmatprep.mubr.f32.mxu0 %v1769_v0  ;;  %442 = vmatprep.mubr.f32.mxu1 %v1769_v0  ;;  %v160_v3 = vld [vmem:[%s2290_s1] sm:$0xff]  ;;  %v161_v5 = vld [vmem:[%s2290_s1 + $0x8] sm:$0xff]  ;;  %v162_v6 = vld [vmem:[%s2290_s1 + $0x10] sm:$0xff]  ;;  %vm929_vm2 = vcmask 1042434   ;;  %vm931_vm3 = vcmask 1043459   ;;  %vm933_vm4 = vcmask 1044484  }
  0x39   : > { %259 = vmatprep.subr.mxu0 %v224_v1  ;;  %v1538_v4 = vmul.f32 -1.442695, %v160_v3  ;;  %v1539_v7 = vmul.f32 -1.442695, %v161_v5  ;;  %v1540_v8 = vmul.f32 -1.442695, %v162_v6 }
  0x3a   : > { %260 = vmatpush1.msra.mxu0 %v223_v2  ;;  %v163_v9 = vld [vmem:[%s2290_s1 + $0x18] sm:$0xff]  ;;  %v225_v11 = vld [vmem:[%s1895_s29 + $0x10] sm:$0xff]  ;;  %v228_v12 = vld [vmem:[%s1895_s29 + $0x28] sm:$0xff]  ;;  %vm935_vm5 = vcmask 1045509   ;;  %vm937_vm6 = vcmask 1046534   ;;  %vm939_vm7 = vcmask 1047559  }
  0x3b   : > { %1634 = vpow2.f32 %v1538_v4  ;;  %v226_v10 = vld [vmem:[%s1895_s29 + $0x18] sm:$0xff]  ;;  %v1541_v13 = vmul.f32 -1.442695, %v163_v9  ;;  %497 = vmatprep.subr.mxu0 %v228_v12  ;;  %v164_v14 = vld [vmem:[%s2290_s1 + $0x20] sm:$0xff]  ;;  %v165_v17 = vld [vmem:[%s2290_s1 + $0x28] sm:$0xff]  ;;  %s1583_s30 = sshll.u32 %s1807_s13, 4 }
  0x3c   : > { %1636 = vpow2.f32 %v1539_v7  ;;  %378 = vmatprep.subr.mxu1 %v226_v10  ;;  %v230_v15 = vld [vmem:[%s1895_s29 + $0x38] sm:$0xff]  ;;  %v1542_v16 = vmul.f32 -1.442695, %v164_v14  ;;  %v1543_v19 = vmul.f32 -1.442695, %v165_v17  ;;  %v166_v22 = vld [vmem:[%s2290_s1 + $0x30] sm:$0xff]  ;;  %s2245_s6 = scalar_lea.hbm %s2291_s2, %s1583_s30 }
  0x3d   : > { %1638 = vpow2.f32 %v1540_v8  ;;  %379 = vmatpush1.msra.mxu1 %v225_v11  ;;  %v1544_v25 = vmul.f32 -1.442695, %v166_v22  ;;  %v167_v27 = vld [vmem:[%s2290_s1 + $0x38] sm:$0xff]  ;;  %v168_v31 = vld [vmem:[%s2290_s1 + $0x40] sm:$0xff]  ;;  %v229_v37 = vld [vmem:[%s1895_s29 + $0x30] sm:$0xff]  ;;  %s158_s20 = scalar_lea.vmem [#allocation6], %s1891_s25 }
  0x3e   : > { %616 = vmatprep.subr.mxu1 %v230_v15  ;;  %1640 = vpow2.f32 %v1541_v13  ;;  %v1545_v29 = vmul.f32 -1.442695, %v167_v27  ;;  %v1546_v33 = vmul.f32 -1.442695, %v168_v31  ;;  %v227_v36 = vld [vmem:[%s1895_s29 + $0x20] sm:$0xff]  ;;  %s1464_s3 = sshll.u32 %s158_s20, 4  ;;  %s2247_s3 = int_to_ptr.vmem [resolvable:$true] %s1464_s3 }
  0x3f   : > { %1642 = vpow2.f32 %v1542_v16  ;;  %s1700_s7 = scalar_lea.vmem %s2247_s3, 16  ;;  %p2301_p11 = scmp.ne.s32.totalorder %s2295_s21, 0 }
  0x40   : > { %p1701_p6 = scmp.ne.s32.totalorder %s2247_s3, %s1700_s7  ;;  %s1770_s13 = smov [#allocation6]  }
  0x41   : > { %s1704_s8 = sshll.u32 %s1770_s13, 4  ;;  %s1705_s8 = int_to_ptr.vmem [resolvable:$false] %s1704_s8 }
  0x42   : > { %p1702_p12 = pnand %p1701_p6, %p2301_p11  ;;  %s1706_s14 = scalar_lea.vmem %s1705_s8, 32 }
  0x43   : > { %p1707_p7 = scmp.lt.s32.totalorder %s2247_s3, %s1705_s8  ;;  %p1708_p10 = scmp.lt.s32.totalorder %s1706_s14, %s1700_s7 }
  0x44   : > { %p1703_p13 = pneg %p1702_p12 }
  0x45   : > { %v1635_v18 = vpop.eup %1634  ;;  %p1709_p2 = por %p1708_p10, %p1707_p7 }
  0x46   : > { %v1637_v20 = vpop.eup %1636  ;;  %v196_v21 = vadd.f32 1.0, %v1635_v18 }
  0x47   : > { %v1639_v23 = vpop.eup %1638  ;;  %v197_v24 = vadd.f32 1.0, %v1637_v20  ;;  %p1710_p4 = pnand %p1709_p2, %p1703_p13 }
  0x48   : > { %1644 = vrcp.f32 %v196_v21  ;;  %v198_v26 = vadd.f32 1.0, %v1639_v23  ;;  %v1641_v28 = vpop.eup %1640 }
  0x49   : > { %1646 = vpow2.f32 %v1543_v19  ;;  %v199_v30 = vadd.f32 1.0, %v1641_v28  ;;  %v1643_v32 = vpop.eup %1642 }
  0x4a   : > { %1648 = vrcp.f32 %v197_v24  ;;  %v200_v35 = vadd.f32 1.0, %v1643_v32 }
  0x4b   : > { %1650 = vpow2.f32 %v1544_v25 }
  0x4c   : > { %1652 = vrcp.f32 %v198_v26 }
  0x4d   : > { %1654 = vpow2.f32 %v1545_v29 }
  0x4e   : > { %1656 = vrcp.f32 %v199_v30 }
  0x4f   : > { %1658 = vpow2.f32 %v1546_v33 }
  0x50   : > { %1660 = vrcp.f32 %v200_v35  ;;  %v890_v35 = vld [vmem:[%s1895_s29 + $0xf] ss:$0 sm:$0xff] }
  0x52   : > { %v1936_v34 = vpop.eup %1644 }
  0x53   : > { %v1647_v38 = vpop.eup %1646  ;;  %1547 = vmatmul.mubr.msk.f32.vlgmr.msra.gmra.mrb[0].mxu0 %vm231_vm0, %v1936_v34  ;;  %1556 = vmatmul.mubr.msk.f32.vlgmr.msra.gmra.mrb[0].mxu1 %vm231_vm0, %v1936_v34 }
  0x54   : > { %v1649_v39 = vpop.eup %1648  ;;  %329 = vmatprep.mubr.f32.mxu0 %v1769_v0  ;;  %448 = vmatprep.mubr.f32.mxu1 %v1769_v0  ;;  %v201_v40 = vadd.f32 1.0, %v1647_v38 }
  0x55   : > { %498 = vmatpush1.msra.mxu0 %v227_v36  ;;  %617 = vmatpush1.msra.mxu1 %v229_v37  ;;  %v1651_v41 = vpop.eup %1650 }
  0x56   : > { %v1653_v42 = vpop.eup %1652  ;;  %1662 = vrcp.f32 %v201_v40  ;;  %v202_v43 = vadd.f32 1.0, %v1651_v41 }
  0x57   : > { %1548 = vmatmul.mubr.msk.f32.gmra.mrb[2].mxu0 %vm231_vm0, %v1649_v39  ;;  %1557 = vmatmul.mubr.msk.f32.gmra.mrb[2].mxu1 %vm231_vm0, %v1649_v39  ;;  %v1655_v44 = vpop.eup %1654 }
  0x58   : > { %335 = vmatprep.mubr.f32.mxu0 %v1769_v0  ;;  %454 = vmatprep.mubr.f32.mxu1 %v1769_v0  ;;  %v1657_v45 = vpop.eup %1656  ;;  %1664 = vrcp.f32 %v202_v43  ;;  %v203_v46 = vadd.f32 1.0, %v1655_v44 }
  0x59   : > { %v1659_v47 = vpop.eup %1658 }
  0x5a   : > { %v1661_v48 = vpop.eup %1660  ;;  %1666 = vrcp.f32 %v203_v46  ;;  %v204_v49 = vadd.f32 1.0, %v1659_v47 }
  0x5b   : > { %1549 = vmatmul.mubr.msk.f32.gmra.mrb[4].mxu0 %vm231_vm0, %v1653_v42  ;;  %1558 = vmatmul.mubr.msk.f32.gmra.mrb[4].mxu1 %vm231_vm0, %v1653_v42 }
  0x5c   : > { %341 = vmatprep.mubr.f32.mxu0 %v1769_v0  ;;  %460 = vmatprep.mubr.f32.mxu1 %v1769_v0  ;;  %1668 = vrcp.f32 %v204_v49 }
  0x5f   : > { %1550 = vmatmul.mubr.msk.f32.gmra.mrb[6].mxu0 %vm231_vm0, %v1657_v45  ;;  %1559 = vmatmul.mubr.msk.f32.gmra.mrb[6].mxu1 %vm231_vm0, %v1657_v45 }
  0x60   : > { %347 = vmatprep.mubr.f32.mxu0 %v1769_v0  ;;  %466 = vmatprep.mubr.f32.mxu1 %v1769_v0  ;;  %v1663_v50 = vpop.eup %1662 }
  0x62   : > { %v1665_v51 = vpop.eup %1664 }
  0x63   : > { %1551 = vmatmul.mubr.msk.f32.gmra.mrb[8].mxu0 %vm231_vm0, %v1661_v48  ;;  %1560 = vmatmul.mubr.msk.f32.gmra.mrb[8].mxu1 %vm231_vm0, %v1661_v48 }
  0x64   : > { %353 = vmatprep.mubr.f32.mxu0 %v1769_v0  ;;  %472 = vmatprep.mubr.f32.mxu1 %v1769_v0  ;;  %v1667_v52 = vpop.eup %1666 }
  0x66   : > { %v1669_v53 = vpop.eup %1668 }
  0x67   : > { %1552 = vmatmul.mubr.msk.f32.gmra.mrb[10].mxu0 %vm231_vm0, %v1663_v50  ;;  %1561 = vmatmul.mubr.msk.f32.gmra.mrb[10].mxu1 %vm231_vm0, %v1663_v50 }
  0x68   : > { %359 = vmatprep.mubr.f32.mxu0 %v1769_v0  ;;  %478 = vmatprep.mubr.f32.mxu1 %v1769_v0 }
  0x6b   : > { %1553 = vmatmul.mubr.msk.f32.gmra.mrb[12].mxu0 %vm231_vm0, %v1665_v51  ;;  %1562 = vmatmul.mubr.msk.f32.gmra.mrb[12].mxu1 %vm231_vm0, %v1665_v51 }
  0x6c   : > { %365 = vmatprep.mubr.f32.mxu0 %v1769_v0  ;;  %484 = vmatprep.mubr.f32.mxu1 %v1769_v0 }
  0x6f   : > { %1554 = vmatmul.mubr.msk.f32.gmra.mrb[14].mxu0 %vm231_vm0, %v1667_v52  ;;  %1563 = vmatmul.mubr.msk.f32.gmra.mrb[14].mxu1 %vm231_vm0, %v1667_v52 }
  0x70   : > { %371 = vmatprep.mubr.f32.mxu0 %v1769_v0  ;;  %490 = vmatprep.mubr.f32.mxu1 %v1769_v0 }
  0x73   : > { %1555 = vmatmul.mubr.msk.f32.gmra.mrb[16].mxu0 %vm231_vm0, %v1669_v53  ;;  %1564 = vmatmul.mubr.msk.f32.gmra.mrb[16].mxu1 %vm231_vm0, %v1669_v53 }
  0x74   : > { %561 = vmatprep.mubr.f32.mxu0 %v1769_v0  ;;  %680 = vmatprep.mubr.f32.mxu1 %v1769_v0 }
  0x77   : > { %1565 = vmatmul.mubr.msk.f32.vlgmr.msra.gmra.mrb[18].mxu0 %vm231_vm0, %v1936_v34  ;;  %1574 = vmatmul.mubr.msk.f32.vlgmr.msra.gmra.mrb[18].mxu1 %vm231_vm0, %v1936_v34 }
  0x78   : > { %567 = vmatprep.mubr.f32.mxu0 %v1769_v0  ;;  %686 = vmatprep.mubr.f32.mxu1 %v1769_v0 }
  0x7b   : > { %1566 = vmatmul.mubr.msk.f32.gmra.mrb[20].mxu0 %vm231_vm0, %v1649_v39  ;;  %1575 = vmatmul.mubr.msk.f32.gmra.mrb[20].mxu1 %vm231_vm0, %v1649_v39  ;;  %v892_v39 = vsub.f32 1.0, %v890_v35 }
  0x7c   : > { %573 = vmatprep.mubr.f32.mxu0 %v1769_v0  ;;  %692 = vmatprep.mubr.f32.mxu1 %v1769_v0 }
  0x7f   : > { %1567 = vmatmul.mubr.msk.f32.gmra.mrb[22].mxu0 %vm231_vm0, %v1653_v42  ;;  %1576 = vmatmul.mubr.msk.f32.gmra.mrb[22].mxu1 %vm231_vm0, %v1653_v42 }
  0x80   : > { %579 = vmatprep.mubr.f32.mxu0 %v1769_v0  ;;  %698 = vmatprep.mubr.f32.mxu1 %v1769_v0 }
  0x83   : > { %1568 = vmatmul.mubr.msk.f32.gmra.mrb[24].mxu0 %vm231_vm0, %v1657_v45  ;;  %1577 = vmatmul.mubr.msk.f32.gmra.mrb[24].mxu1 %vm231_vm0, %v1657_v45 }
  0x84   : > { %585 = vmatprep.mubr.f32.mxu0 %v1769_v0  ;;  %704 = vmatprep.mubr.f32.mxu1 %v1769_v0 }
  0x87   : > { %1569 = vmatmul.mubr.msk.f32.gmra.mrb[26].mxu0 %vm231_vm0, %v1661_v48  ;;  %1578 = vmatmul.mubr.msk.f32.gmra.mrb[26].mxu1 %vm231_vm0, %v1661_v48 }
  0x88   : > { %591 = vmatprep.mubr.f32.mxu0 %v1769_v0  ;;  %710 = vmatprep.mubr.f32.mxu1 %v1769_v0 }
  0x8b   : > { %1570 = vmatmul.mubr.msk.f32.gmra.mrb[28].mxu0 %vm231_vm0, %v1663_v50  ;;  %1579 = vmatmul.mubr.msk.f32.gmra.mrb[28].mxu1 %vm231_vm0, %v1663_v50 }
  0x8c   : > { %597 = vmatprep.mubr.f32.mxu0 %v1769_v0  ;;  %716 = vmatprep.mubr.f32.mxu1 %v1769_v0 }
  0x8f   : > { %1571 = vmatmul.mubr.msk.f32.gmra.mrb[30].mxu0 %vm231_vm0, %v1665_v51  ;;  %1580 = vmatmul.mubr.msk.f32.gmra.mrb[30].mxu1 %vm231_vm0, %v1665_v51 }
  0x90   : > { %603 = vmatprep.mubr.f32.mxu0 %v1769_v0  ;;  %722 = vmatprep.mubr.f32.mxu1 %v1769_v0 }
  0x93   : > { %1572 = vmatmul.mubr.msk.f32.gmra.mrb[32].mxu0 %vm231_vm0, %v1667_v52  ;;  %1581 = vmatmul.mubr.msk.f32.gmra.mrb[32].mxu1 %vm231_vm0, %v1667_v52 }
  0x94   : > { %609 = vmatprep.mubr.f32.mxu0 %v1769_v0  ;;  %728 = vmatprep.mubr.f32.mxu1 %v1769_v0 }
  0x97   : > { %1573 = vmatmul.mubr.msk.f32.gmra.mrb[34].mxu0 %vm231_vm0, %v1669_v53  ;;  %1582 = vmatmul.mubr.msk.f32.gmra.mrb[34].mxu1 %vm231_vm0, %v1669_v53 }
 0x126   : > { %v2014_v54 = vpop.f32.mrb[0].mxu0  ;;  %v444_v55 = vpop.f32.mrb[0].mxu1 }
 0x127   : > { %v327_v56 = vpop.f32.mrb[1].mxu0  ;;  %v446_v57 = vpop.f32.mrb[1].mxu1  ;;  %v891_v55 = vmul.f32 %v890_v35, %v2014_v54 }
 0x12a   : > { %v331_v58 = vpop.f32.mrb[2].mxu0  ;;  %v2016_v59 = vpop.f32.mrb[2].mxu1 }
 0x12b   : > { %v333_v60 = vpop.f32.mrb[3].mxu0  ;;  %v2018_v61 = vpop.f32.mrb[3].mxu1 }
 0x12c   : > { %v816_v62 = vmax.f32 %v333_v60, 0.0 }
 0x12e   : > { %v824_v63 = vmin.f32 %v816_v62, 1.0  ;;  %v337_v1 = vpop.f32.mrb[4].mxu0  ;;  %v2020_v2 = vpop.f32.mrb[4].mxu1 }
 0x12f   : > { %v339_v0 = vpop.f32.mrb[5].mxu0  ;;  %v2022_v3 = vpop.f32.mrb[5].mxu1 }
 0x130   : > { %v832_v4 = vmul.f32 %v824_v63, %v2014_v54  ;;  %v817_v5 = vmax.f32 %v339_v0, 0.0 }
 0x132   : > { %v840_v6 = vrot.slane %v832_v4, 4  ;;  %v825_v7 = vmin.f32 %v817_v5, 1.0  ;;  %v343_v8 = vpop.f32.mrb[6].mxu0  ;;  %v2025_v9 = vpop.f32.mrb[6].mxu1 }
 0x133   : > { %v345_v10 = vpop.f32.mrb[7].mxu0  ;;  %v2027_v11 = vpop.f32.mrb[7].mxu1 }
 0x134   : > { %v841_v12 = vadd.f32 %v840_v6, %v832_v4  ;;  %v833_v13 = vmul.f32 %v825_v7, %v2014_v54  ;;  %v818_v14 = vmax.f32 %v345_v10, 0.0 }
 0x136   : > { %v842_v15 = vrot.slane %v841_v12, 2  ;;  %v846_v16 = vrot.slane %v833_v13, 4  ;;  %v826_v17 = vmin.f32 %v818_v14, 1.0  ;;  %v349_v18 = vpop.f32.mrb[8].mxu0  ;;  %v2030_v19 = vpop.f32.mrb[8].mxu1 }
 0x137   : > { %v351_v20 = vpop.f32.mrb[9].mxu0  ;;  %v2032_v21 = vpop.f32.mrb[9].mxu1 }
 0x138   : > { %v843_v22 = vadd.f32 %v842_v15, %v841_v12  ;;  %v847_v23 = vadd.f32 %v846_v16, %v833_v13  ;;  %v834_v24 = vmul.f32 %v826_v17, %v2014_v54  ;;  %v819_v25 = vmax.f32 %v351_v20, 0.0 }
 0x13a   : > { %v844_v26 = vrot.slane %v843_v22, 1  ;;  %v848_v27 = vrot.slane %v847_v23, 2  ;;  %v852_v28 = vrot.slane %v834_v24, 4  ;;  %v827_v29 = vmin.f32 %v819_v25, 1.0  ;;  %v355_v30 = vpop.f32.mrb[10].mxu0  ;;  %v2035_v31 = vpop.f32.mrb[10].mxu1 }
 0x13b   : > { %v357_v32 = vpop.f32.mrb[11].mxu0  ;;  %v2037_v33 = vpop.f32.mrb[11].mxu1 }
 0x13c   : > { %v845_v34 = vadd.f32 %v844_v26, %v843_v22  ;;  %v849_v36 = vadd.f32 %v848_v27, %v847_v23  ;;  %v853_v37 = vadd.f32 %v852_v28, %v834_v24  ;;  %v835_v38 = vmul.f32 %v827_v29, %v2014_v54 }
 0x13d   : > { %v820_v40 = vmax.f32 %v357_v32, 0.0 }
 0x13e   : > { %v888_v41 = vmax.f32 %v845_v34, 0.0  ;;  %v850_v42 = vrot.slane %v849_v36, 1  ;;  %v854_v43 = vrot.slane %v853_v37, 2  ;;  %v858_v44 = vrot.slane %v835_v38, 4  ;;  %v361_v45 = vpop.f32.mrb[12].mxu0  ;;  %v2041_v46 = vpop.f32.mrb[12].mxu1 }
 0x13f   : > { %v828_v47 = vmin.f32 %v820_v40, 1.0  ;;  %v363_v48 = vpop.f32.mrb[13].mxu0  ;;  %v2043_v49 = vpop.f32.mrb[13].mxu1 }
 0x140   : > { %v889_v50 = vmin.f32 %v888_v41, 1.0  ;;  %v851_v51 = vadd.f32 %v850_v42, %v849_v36  ;;  %v855_v52 = vadd.f32 %v854_v43, %v853_v37  ;;  %v859_v53 = vadd.f32 %v858_v44, %v835_v38 }
 0x141   : > { %v836_v56 = vmul.f32 %v828_v47, %v2014_v54  ;;  %v821_v57 = vmax.f32 %v363_v48, 0.0 }
 0x142   : > { %v893_v58 = vmul.f32 %v892_v39, %v889_v50  ;;  %v928_v60 = vsel %vm927_vm1, %v851_v51, %v845_v34  ;;  %v856_v62 = vrot.slane %v855_v52, 1  ;;  %v860_v63 = vrot.slane %v859_v53, 2  ;;  %v367_v1 = vpop.f32.mrb[14].mxu0  ;;  %v2048_v0 = vpop.f32.mrb[14].mxu1 }
 0x143   : > { %v864_v4 = vrot.slane %v836_v56, 4  ;;  %v829_v5 = vmin.f32 %v821_v57, 1.0  ;;  %v369_v6 = vpop.f32.mrb[15].mxu0  ;;  %v2050_v7 = vpop.f32.mrb[15].mxu1 }
 0x144   : > { %v2052_v8 = vadd.f32 %v893_v58, %v891_v55  ;;  %v857_v10 = vadd.f32 %v856_v62, %v855_v52  ;;  %v861_v12 = vadd.f32 %v860_v63, %v859_v53  ;;  %v822_v13 = vmax.f32 %v369_v6, 0.0 }
 0x145   : > { %v865_v14 = vadd.f32 %v864_v4, %v836_v56  ;;  %v837_v15 = vmul.f32 %v829_v5, %v2014_v54 }
 0x146   : > { %v930_v16 = vsel %vm929_vm2, %v857_v10, %v928_v60  ;;  %v862_v17 = vrot.slane %v861_v12, 1  ;;  %v830_v18 = vmin.f32 %v822_v13, 1.0  ;;  %v373_v20 = vpop.f32.mrb[16].mxu0  ;;  %v2056_v22 = vpop.f32.mrb[16].mxu1 }
 0x147   : > { %v866_v23 = vrot.slane %v865_v14, 2  ;;  %v870_v24 = vrot.slane %v837_v15, 4  ;;  %v375_v25 = vpop.f32.mrb[17].mxu0  ;;  %v2058_v26 = vpop.f32.mrb[17].mxu1  ;;  %v905_v20 = vmax.f32 %v2025_v9, 0.0 }
 0x148   : > { %v863_v27 = vadd.f32 %v862_v17, %v861_v12  ;;  %v838_v28 = vmul.f32 %v830_v18, %v2014_v54  ;;  %v823_v29 = vmax.f32 %v375_v25, 0.0  ;;  %v2080_v12 = vld [vmem:[%s1895_s29 + $0x17] ss:$0 sm:$0xff]  ;;  %v903_v17 = vmax.f32 %v2016_v59, 0.0 }
 0x149   : > { %v867_v30 = vadd.f32 %v866_v23, %v865_v14  ;;  %v871_v32 = vadd.f32 %v870_v24, %v837_v15  ;;  %v909_v15 = vmax.f32 %v2048_v0, 0.0  ;;  %v904_v18 = vmax.f32 %v2020_v2, 0.0  ;;  %v2089_v24 = vld [vmem:[%s1895_s29 + $0x1f] ss:$0 sm:$0xff] }
 0x14a   : > { %v932_v34 = vsel %vm931_vm3, %v863_v27, %v930_v16  ;;  %v876_v35 = vrot.slane %v838_v28, 4  ;;  %v831_v36 = vmin.f32 %v823_v29, 1.0  ;;  %v563_v37 = vpop.f32.mrb[18].mxu0  ;;  %v682_v38 = vpop.f32.mrb[18].mxu1  ;;  %v910_v16 = vmax.f32 %v2056_v22, 0.0 }
 0x14b   : > { %v868_v39 = vrot.slane %v867_v30, 1  ;;  %v872_v40 = vrot.slane %v871_v32, 2  ;;  %v565_v41 = vpop.f32.mrb[19].mxu0  ;;  %v684_v42 = vpop.f32.mrb[19].mxu1  ;;  %v906_v23 = vmax.f32 %v2030_v19, 0.0  ;;  %v908_v29 = vmax.f32 %v2041_v46, 0.0 }
 0x14c   : > { %v877_v43 = vadd.f32 %v876_v35, %v838_v28  ;;  %v839_v44 = vmul.f32 %v831_v36, %v2014_v54  ;;  %v907_v28 = vmax.f32 %v2035_v31, 0.0  ;;  %v1002_v59 = vsub.f32 1.0, %v2080_v12 }
 0x14d   : > { %v869_v45 = vadd.f32 %v868_v39, %v867_v30  ;;  %v873_v47 = vadd.f32 %v872_v40, %v871_v32  ;;  %v1105_v2 = vsub.f32 1.0, %v2089_v24  ;;  %v1013_v30 = vmax.f32 %v2018_v61, 0.0 }
 0x14e   : > { %v878_v48 = vrot.slane %v877_v43, 2  ;;  %v882_v50 = vrot.slane %v839_v44, 4  ;;  %v2063_v51 = vpop.f32.mrb[20].mxu0  ;;  %v2065_v52 = vpop.f32.mrb[20].mxu1  ;;  %v918_v35 = vmin.f32 %v910_v16, 1.0  ;;  %v911_v31 = vmin.f32 %v903_v17, 1.0 }
 0x14f   : > { %v934_v53 = vsel %vm933_vm4, %v869_v45, %v932_v34  ;;  %v874_v55 = vrot.slane %v873_v47, 1  ;;  %v2068_v56 = vpop.f32.mrb[21].mxu0  ;;  %v2070_v57 = vpop.f32.mrb[21].mxu1  ;;  %v917_v34 = vmin.f32 %v909_v15, 1.0  ;;  %v912_v36 = vmin.f32 %v904_v18, 1.0 }
 0x150   : > { %v879_v58 = vadd.f32 %v878_v48, %v877_v43  ;;  %v883_v60 = vadd.f32 %v882_v50, %v839_v44  ;;  %v913_v46 = vmin.f32 %v905_v20, 1.0  ;;  %v914_v37 = vmin.f32 %v906_v23, 1.0 }
 0x151   : > { %v875_v54 = vadd.f32 %v874_v55, %v873_v47  ;;  %v1014_v38 = vmax.f32 %v2022_v3, 0.0  ;;  %v915_v40 = vmin.f32 %v907_v28, 1.0  ;;  %v916_v41 = vmin.f32 %v908_v29, 1.0 }
 0x152   : > { %v880_v62 = vrot.slane %v879_v58, 1  ;;  %v884_v63 = vrot.slane %v883_v60, 2  ;;  %v2072_v1 = vpop.f32.mrb[22].mxu0  ;;  %v2074_v4 = vpop.f32.mrb[22].mxu1  ;;  %v1016_v61 = vmax.f32 %v2032_v21, 0.0 }
 0x153   : > { %v936_v5 = vsel %vm935_vm5, %v875_v54, %v934_v53  ;;  %v2077_v6 = vpop.f32.mrb[23].mxu0  ;;  %v696_v10 = vpop.f32.mrb[23].mxu1 }
 0x154   : > { %v881_v13 = vadd.f32 %v880_v62, %v879_v58  ;;  %v885_v14 = vadd.f32 %v884_v63, %v883_v60 }
 0x156   : > { %v938_v25 = vsel %vm937_vm6, %v881_v13, %v936_v5  ;;  %v886_v27 = vrot.slane %v885_v14, 1  ;;  %v2094_v0 = vpop.f32.mrb[24].mxu0  ;;  %v2096_v22 = vpop.f32.mrb[24].mxu1 }
 0x157   : > { %v2100_v9 = vpop.f32.mrb[25].mxu0  ;;  %v702_v19 = vpop.f32.mrb[25].mxu1 }
 0x158   : > { %v887_v32 = vadd.f32 %v886_v27, %v885_v14 }
 0x15a   : > { %v940_v39 = vsel %vm939_vm7, %v887_v32, %v938_v25  ;;  %v2105_v42 = vpop.f32.mrb[26].mxu0  ;;  %v2107_v43 = vpop.f32.mrb[26].mxu1 }
 0x15b   : > { %v942_v44 = vmul.f32 %v940_v39, %v911_v31  ;;  %v943_v45 = vmul.f32 %v940_v39, %v912_v36  ;;  %v944_v47 = vmul.f32 %v940_v39, %v913_v46  ;;  %v945_v48 = vmul.f32 %v940_v39, %v914_v37  ;;  %v2109_v50 = vpop.f32.mrb[27].mxu0  ;;  %v708_v53 = vpop.f32.mrb[27].mxu1 }
 0x15c   : > { %v946_v55 = vmul.f32 %v940_v39, %v915_v40  ;;  %v947_v58 = vmul.f32 %v940_v39, %v916_v41  ;;  %v948_v60 = vmul.f32 %v940_v39, %v917_v34  ;;  %v949_v54 = vmul.f32 %v940_v39, %v918_v35 }
 0x15d   : > { %v950_v3 = vrot.slane %v942_v44, 4  ;;  %v956_v62 = vrot.slane %v943_v45, 4  ;;  %v962_v63 = vrot.slane %v944_v47, 4  ;;  %v968_v5 = vrot.slane %v945_v48, 4 }
 0x15e   : > { %v974_v10 = vrot.slane %v946_v55, 4  ;;  %v980_v13 = vrot.slane %v947_v58, 4  ;;  %v986_v14 = vrot.slane %v948_v60, 4  ;;  %v992_v15 = vrot.slane %v949_v54, 4  ;;  %v2111_v16 = vpop.f32.mrb[28].mxu0  ;;  %v2113_v17 = vpop.f32.mrb[28].mxu1 }
 0x15f   : > { %v951_v18 = vadd.f32 %v950_v3, %v942_v44  ;;  %v957_v20 = vadd.f32 %v956_v62, %v943_v45  ;;  %v963_v23 = vadd.f32 %v962_v63, %v944_v47  ;;  %v969_v25 = vadd.f32 %v968_v5, %v945_v48  ;;  %v2115_v27 = vpop.f32.mrb[29].mxu0  ;;  %v714_v28 = vpop.f32.mrb[29].mxu1 }
 0x160   : > { %v975_v29 = vadd.f32 %v974_v10, %v946_v55  ;;  %v981_v19 = vadd.f32 %v980_v13, %v947_v58  ;;  %v987_v32 = vadd.f32 %v986_v14, %v948_v60  ;;  %v993_v34 = vadd.f32 %v992_v15, %v949_v54  ;;  %v2124_v15 = vld [vmem:[%s1895_s29 + $0x27] ss:$0 sm:$0xff] }
 0x161   : > { %v952_v35 = vrot.slane %v951_v18, 2  ;;  %v958_v31 = vrot.slane %v957_v20, 2  ;;  %v964_v36 = vrot.slane %v963_v23, 2  ;;  %v970_v46 = vrot.slane %v969_v25, 2 }
 0x162   : > { %v976_v37 = vrot.slane %v975_v29, 2  ;;  %v982_v39 = vrot.slane %v981_v19, 2  ;;  %v988_v40 = vrot.slane %v987_v32, 2  ;;  %v994_v41 = vrot.slane %v993_v34, 2  ;;  %v2117_v53 = vpop.f32.mrb[30].mxu0  ;;  %v2119_v44 = vpop.f32.mrb[30].mxu1 }
 0x163   : > { %v953_v45 = vadd.f32 %v952_v35, %v951_v18  ;;  %v959_v47 = vadd.f32 %v958_v31, %v957_v20  ;;  %v965_v48 = vadd.f32 %v964_v36, %v963_v23  ;;  %v971_v55 = vadd.f32 %v970_v46, %v969_v25  ;;  %v2121_v58 = vpop.f32.mrb[31].mxu0  ;;  %v720_v60 = vpop.f32.mrb[31].mxu1 }
 0x164   : > { %v977_v54 = vadd.f32 %v976_v37, %v975_v29  ;;  %v983_v3 = vadd.f32 %v982_v39, %v981_v19  ;;  %v989_v62 = vadd.f32 %v988_v40, %v987_v32  ;;  %v995_v63 = vadd.f32 %v994_v41, %v993_v34 }
 0x165   : > { %v954_v5 = vrot.slane %v953_v45, 1  ;;  %v960_v10 = vrot.slane %v959_v47, 1  ;;  %v966_v13 = vrot.slane %v965_v48, 1  ;;  %v972_v14 = vrot.slane %v971_v55, 1 }
 0x166   : > { %v1021_v28 = vmin.f32 %v1013_v30, 1.0  ;;  %v1022_v18 = vmin.f32 %v1014_v38, 1.0  ;;  %v978_v20 = vrot.slane %v977_v54, 1  ;;  %v2129_v25 = vpop.f32.mrb[32].mxu0  ;;  %v2131_v35 = vpop.f32.mrb[32].mxu1  ;;  %v984_v34 = vrot.slane %v983_v3, 1 }
 0x167   : > { %v955_v29 = vadd.f32 %v954_v5, %v953_v45  ;;  %v961_v19 = vadd.f32 %v960_v10, %v959_v47  ;;  %v967_v32 = vadd.f32 %v966_v13, %v965_v48  ;;  %v2133_v31 = vpop.f32.mrb[33].mxu0  ;;  %v726_v36 = vpop.f32.mrb[33].mxu1  ;;  %v1015_v46 = vmax.f32 %v2027_v11, 0.0 }
 0x168   : > { %v1017_v30 = vmax.f32 %v2037_v33, 0.0  ;;  %v990_v38 = vrot.slane %v989_v62, 1  ;;  %v973_v40 = vadd.f32 %v972_v14, %v971_v55  ;;  %v996_v41 = vrot.slane %v995_v63, 1 }
 0x169   : > { %v998_v37 = vmax.f32 %v955_v29, 0.0  ;;  %v1037_v39 = vsel %vm927_vm1, %v961_v19, %v955_v29  ;;  %v979_v47 = vadd.f32 %v978_v20, %v977_v54  ;;  %v1018_v48 = vmax.f32 %v2043_v49, 0.0 }
 0x16a   : > { %v1038_v45 = vsel %vm929_vm2, %v967_v32, %v1037_v39  ;;  %v1019_v60 = vmax.f32 %v2050_v7, 0.0  ;;  %v2142_v5 = vpop.f32.mrb[34].mxu0  ;;  %v2144_v11 = vpop.f32.mrb[34].mxu1  ;;  %v985_v10 = vadd.f32 %v984_v34, %v983_v3  ;;  %v1020_v13 = vmax.f32 %v2058_v26, 0.0 }
 0x16b   : > { %v999_v21 = vmin.f32 %v998_v37, 1.0  ;;  %v1039_v33 = vsel %vm931_vm3, %v973_v40, %v1038_v45  ;;  %v2148_v29 = vpop.f32.mrb[35].mxu0  ;;  %v732_v55 = vpop.f32.mrb[35].mxu1  ;;  %v1023_v14 = vmin.f32 %v1015_v46, 1.0  ;;  %v1024_v19 = vmin.f32 %v1016_v61, 1.0 }
 0x16c   : > { %v1040_v54 = vsel %vm933_vm4, %v979_v47, %v1039_v33  ;;  %v991_v49 = vadd.f32 %v990_v38, %v989_v62  ;;  %v1001_v7 = vmul.f32 %v2080_v12, %v2052_v8  ;;  %v997_v36 = vadd.f32 %v996_v41, %v995_v63 }
 0x16d   : > { %v1003_v20 = vmul.f32 %v1002_v59, %v999_v21  ;;  %v1041_v32 = vsel %vm935_vm5, %v985_v10, %v1040_v54  ;;  %v1025_v3 = vmin.f32 %v1017_v30, 1.0  ;;  %v1026_v34 = vmin.f32 %v1018_v48, 1.0 }
 0x16e   : > { %v1042_v26 = vsel %vm937_vm6, %v991_v49, %v1041_v32  ;;  %v1027_v37 = vmin.f32 %v1019_v60, 1.0  ;;  %v1028_v61 = vmin.f32 %v1020_v13, 1.0  ;;  %v1116_v62 = vmax.f32 %v2063_v51, 0.0 }
 0x16f   : > { %v1043_v46 = vsel %vm939_vm7, %v997_v36, %v1042_v26  ;;  %v2158_v39 = vadd.f32 %v1003_v20, %v1001_v7 }
 0x170   : > { %v1045_v38 = vmul.f32 %v1043_v46, %v1021_v28  ;;  %v1046_v8 = vmul.f32 %v1043_v46, %v1022_v18  ;;  %v1047_v40 = vmul.f32 %v1043_v46, %v1023_v14  ;;  %v1048_v12 = vmul.f32 %v1043_v46, %v1024_v19 }
 0x171   : > { %v1049_v59 = vmul.f32 %v1043_v46, %v1025_v3  ;;  %v1050_v45 = vmul.f32 %v1043_v46, %v1026_v34  ;;  %v1051_v47 = vmul.f32 %v1043_v46, %v1027_v37  ;;  %v1052_v63 = vmul.f32 %v1043_v46, %v1028_v61 }
 0x172   : > { %v1053_v30 = vrot.slane %v1045_v38, 4  ;;  %v1059_v41 = vrot.slane %v1046_v8, 4  ;;  %v1065_v48 = vrot.slane %v1047_v40, 4  ;;  %v1071_v21 = vrot.slane %v1048_v12, 4 }
 0x173   : > { %v1077_v60 = vrot.slane %v1049_v59, 4  ;;  %v1083_v33 = vrot.slane %v1050_v45, 4  ;;  %v1089_v10 = vrot.slane %v1051_v47, 4  ;;  %v1095_v13 = vrot.slane %v1052_v63, 4 }
 0x174   : > { %v1054_v55 = vadd.f32 %v1053_v30, %v1045_v38  ;;  %v1060_v54 = vadd.f32 %v1059_v41, %v1046_v8  ;;  %v1066_v49 = vadd.f32 %v1065_v48, %v1047_v40  ;;  %v1072_v51 = vadd.f32 %v1071_v21, %v1048_v12  ;;  %v2162_v41 = vld [vmem:[%s1895_s29 + $0x2f] ss:$0 sm:$0xff] }
 0x175   : > { %v1078_v28 = vadd.f32 %v1077_v60, %v1049_v59  ;;  %v1084_v18 = vadd.f32 %v1083_v33, %v1050_v45  ;;  %v1090_v14 = vadd.f32 %v1089_v10, %v1051_v47  ;;  %v1096_v19 = vadd.f32 %v1095_v13, %v1052_v63 }
 0x176   : > { %v1055_v7 = vrot.slane %v1054_v55, 2  ;;  %v1061_v20 = vrot.slane %v1060_v54, 2  ;;  %v1067_v32 = vrot.slane %v1066_v49, 2  ;;  %v1073_v36 = vrot.slane %v1072_v51, 2 }
 0x177   : > { %v1079_v3 = vrot.slane %v1078_v28, 2  ;;  %v1085_v34 = vrot.slane %v1084_v18, 2  ;;  %v1091_v26 = vrot.slane %v1090_v14, 2  ;;  %v1097_v37 = vrot.slane %v1096_v19, 2 }
 0x178   : > { %v1056_v46 = vadd.f32 %v1055_v7, %v1054_v55  ;;  %v1062_v61 = vadd.f32 %v1061_v20, %v1060_v54  ;;  %v1068_v23 = vadd.f32 %v1067_v32, %v1066_v49  ;;  %v1074_v38 = vadd.f32 %v1073_v36, %v1072_v51 }
 0x179   : > { %v1080_v8 = vadd.f32 %v1079_v3, %v1078_v28  ;;  %v1086_v40 = vadd.f32 %v1085_v34, %v1084_v18  ;;  %v1092_v12 = vadd.f32 %v1091_v26, %v1090_v14  ;;  %v1098_v59 = vadd.f32 %v1097_v37, %v1096_v19 }
 0x17a   : > { %v1057_v45 = vrot.slane %v1056_v46, 1  ;;  %v1063_v47 = vrot.slane %v1062_v61, 1  ;;  %v1069_v63 = vrot.slane %v1068_v23, 1  ;;  %v1075_v30 = vrot.slane %v1074_v38, 1 }
 0x17b   : > { %v1081_v48 = vrot.slane %v1080_v8, 1  ;;  %v1124_v21 = vmin.f32 %v1116_v62, 1.0  ;;  %v1311_v60 = vsub.f32 1.0, %v2162_v41  ;;  %v1117_v33 = vmax.f32 %v2072_v1, 0.0 }
 0x17c   : > { %v1058_v10 = vadd.f32 %v1057_v45, %v1056_v46  ;;  %v1064_v13 = vadd.f32 %v1063_v47, %v1062_v61  ;;  %v1070_v55 = vadd.f32 %v1069_v63, %v1068_v23  ;;  %v1087_v54 = vrot.slane %v1086_v40, 1 }
 0x17d   : > { %v1093_v49 = vrot.slane %v1092_v12, 1  ;;  %v1118_v51 = vmax.f32 %v2094_v0, 0.0  ;;  %v1119_v28 = vmax.f32 %v2105_v42, 0.0  ;;  %v1122_v18 = vmax.f32 %v2129_v25, 0.0 }
 0x17e   : > { %v1076_v14 = vadd.f32 %v1075_v30, %v1074_v38  ;;  %v1099_v19 = vrot.slane %v1098_v59, 1  ;;  %v1140_v7 = vsel %vm927_vm1, %v1064_v13, %v1058_v10  ;;  %v1101_v62 = vmax.f32 %v1058_v10, 0.0 }
 0x17f   : > { %v1082_v20 = vadd.f32 %v1081_v48, %v1080_v8  ;;  %v1141_v32 = vsel %vm929_vm2, %v1070_v55, %v1140_v7  ;;  %v1120_v1 = vmax.f32 %v2111_v16, 0.0  ;;  %v1121_v23 = vmax.f32 %v2117_v53, 0.0 }
 0x180   : > { %v1088_v36 = vadd.f32 %v1087_v54, %v1086_v40  ;;  %v1142_v3 = vsel %vm931_vm3, %v1076_v14, %v1141_v32  ;;  %v1102_v0 = vmin.f32 %v1101_v62, 1.0  ;;  %v1123_v42 = vmax.f32 %v2142_v5, 0.0 }
 0x181   : > { %v1094_v34 = vadd.f32 %v1093_v49, %v1092_v12  ;;  %v1143_v25 = vsel %vm933_vm4, %v1082_v20, %v1142_v3  ;;  %v1125_v26 = vmin.f32 %v1117_v33, 1.0  ;;  %v1130_v37 = vmin.f32 %v1122_v18, 1.0 }
 0x182   : > { %v1100_v46 = vadd.f32 %v1099_v19, %v1098_v59  ;;  %v1144_v61 = vsel %vm935_vm5, %v1088_v36, %v1143_v25  ;;  %v1104_v38 = vmul.f32 %v2089_v24, %v2158_v39  ;;  %v1106_v16 = vmul.f32 %v1105_v2, %v1102_v0 }
 0x183   : > { %v1145_v53 = vsel %vm937_vm6, %v1094_v34, %v1144_v61  ;;  %v1126_v8 = vmin.f32 %v1118_v51, 1.0  ;;  %v1127_v40 = vmin.f32 %v1119_v28, 1.0  ;;  %v1128_v45 = vmin.f32 %v1120_v1, 1.0 }
 0x184   : > { %v1146_v5 = vsel %vm939_vm7, %v1100_v46, %v1145_v53  ;;  %v2183_v12 = vadd.f32 %v1106_v16, %v1104_v38  ;;  %v1129_v47 = vmin.f32 %v1121_v23, 1.0  ;;  %v1131_v63 = vmin.f32 %v1123_v42, 1.0 }
 0x185   : > { %v1148_v59 = vmul.f32 %v1146_v5, %v1124_v21  ;;  %v1149_v30 = vmul.f32 %v1146_v5, %v1125_v26  ;;  %v1150_v48 = vmul.f32 %v1146_v5, %v1126_v8  ;;  %v1151_v33 = vmul.f32 %v1146_v5, %v1127_v40 }
 0x186   : > { %v1219_v39 = vmax.f32 %v2068_v56, 0.0  ;;  %v1152_v10 = vmul.f32 %v1146_v5, %v1128_v45  ;;  %v1153_v24 = vmul.f32 %v1146_v5, %v1129_v47  ;;  %v1154_v2 = vmul.f32 %v1146_v5, %v1130_v37 }
 0x187   : > { %v1156_v13 = vrot.slane %v1148_v59, 4  ;;  %v1162_v55 = vrot.slane %v1149_v30, 4  ;;  %v1168_v54 = vrot.slane %v1150_v48, 4  ;;  %v1174_v49 = vrot.slane %v1151_v33, 4 }
 0x188   : > { %v1180_v51 = vrot.slane %v1152_v10, 4  ;;  %v1186_v28 = vrot.slane %v1153_v24, 4  ;;  %v1192_v18 = vrot.slane %v1154_v2, 4  ;;  %v1155_v14 = vmul.f32 %v1146_v5, %v1131_v63 }
 0x189   : > { %v1157_v19 = vadd.f32 %v1156_v13, %v1148_v59  ;;  %v1163_v7 = vadd.f32 %v1162_v55, %v1149_v30  ;;  %v1169_v62 = vadd.f32 %v1168_v54, %v1150_v48  ;;  %v1175_v21 = vadd.f32 %v1174_v49, %v1151_v33 }
 0x18a   : > { %v1181_v20 = vadd.f32 %v1180_v51, %v1152_v10  ;;  %v1187_v32 = vadd.f32 %v1186_v28, %v1153_v24  ;;  %v1193_v1 = vadd.f32 %v1192_v18, %v1154_v2  ;;  %v1198_v23 = vrot.slane %v1155_v14, 4 }
 0x18b   : > { %v1158_v56 = vrot.slane %v1157_v19, 2  ;;  %v1164_v36 = vrot.slane %v1163_v7, 2  ;;  %v1170_v3 = vrot.slane %v1169_v62, 2  ;;  %v1176_v0 = vrot.slane %v1175_v21, 2 }
 0x18c   : > { %v1182_v42 = vrot.slane %v1181_v20, 2  ;;  %v1188_v34 = vrot.slane %v1187_v32, 2  ;;  %v1194_v25 = vrot.slane %v1193_v1, 2  ;;  %v1199_v26 = vadd.f32 %v1198_v23, %v1155_v14 }
 0x18d   : > { %v1159_v37 = vadd.f32 %v1158_v56, %v1157_v19  ;;  %v1165_v46 = vadd.f32 %v1164_v36, %v1163_v7  ;;  %v1171_v61 = vadd.f32 %v1170_v3, %v1169_v62  ;;  %v1177_v38 = vadd.f32 %v1176_v0, %v1175_v21 }
 0x18e   : > { %v1183_v16 = vadd.f32 %v1182_v42, %v1181_v20  ;;  %v1189_v53 = vadd.f32 %v1188_v34, %v1187_v32  ;;  %v1195_v8 = vadd.f32 %v1194_v25, %v1193_v1  ;;  %v1200_v40 = vrot.slane %v1199_v26, 2 }
 0x18f   : > { %v1160_v45 = vrot.slane %v1159_v37, 1  ;;  %v1166_v5 = vrot.slane %v1165_v46, 1  ;;  %v1172_v47 = vrot.slane %v1171_v61, 1  ;;  %v1178_v63 = vrot.slane %v1177_v38, 1 }
 0x190   : > { %v1227_v59 = vmin.f32 %v1219_v39, 1.0  ;;  %v1184_v30 = vrot.slane %v1183_v16, 1  ;;  %v1201_v48 = vadd.f32 %v1200_v40, %v1199_v26  ;;  %v1322_v33 = vmax.f32 %v2065_v52, 0.0 }
 0x191   : > { %v1161_v10 = vadd.f32 %v1160_v45, %v1159_v37  ;;  %v1167_v24 = vadd.f32 %v1166_v5, %v1165_v46  ;;  %v1173_v2 = vadd.f32 %v1172_v47, %v1171_v61  ;;  %v1190_v13 = vrot.slane %v1189_v53, 1 }
 0x192   : > { %v1220_v55 = vmax.f32 %v2077_v6, 0.0  ;;  %v1221_v54 = vmax.f32 %v2100_v9, 0.0  ;;  %v1222_v49 = vmax.f32 %v2109_v50, 0.0  ;;  %v1196_v51 = vrot.slane %v1195_v8, 1 }
 0x193   : > { %v1204_v28 = vmax.f32 %v1161_v10, 0.0  ;;  %v1243_v18 = vsel %vm927_vm1, %v1167_v24, %v1161_v10  ;;  %v1179_v14 = vadd.f32 %v1178_v63, %v1177_v38  ;;  %v1202_v39 = vrot.slane %v1201_v48, 1 }
 0x194   : > { %v1244_v19 = vsel %vm929_vm2, %v1173_v2, %v1243_v18  ;;  %v1185_v7 = vadd.f32 %v1184_v30, %v1183_v16  ;;  %v1223_v62 = vmax.f32 %v2115_v27, 0.0  ;;  %v1224_v21 = vmax.f32 %v2121_v58, 0.0 }
 0x195   : > { %v1205_v20 = vmin.f32 %v1204_v28, 1.0  ;;  %v1245_v6 = vsel %vm931_vm3, %v1179_v14, %v1244_v19  ;;  %v1191_v32 = vadd.f32 %v1190_v13, %v1189_v53  ;;  %v1225_v9 = vmax.f32 %v2133_v31, 0.0 }
 0x196   : > { %v1228_v50 = vmin.f32 %v1220_v55, 1.0  ;;  %v1246_v1 = vsel %vm933_vm4, %v1185_v7, %v1245_v6  ;;  %v1197_v23 = vadd.f32 %v1196_v51, %v1195_v8  ;;  %v1226_v56 = vmax.f32 %v2148_v29, 0.0 }
 0x197   : > { %v1207_v36 = vmul.f32 %v2124_v15, %v2183_v12  ;;  %v2300_v3 = vsub.f32 1.0, %v2124_v15  ;;  %v1247_v58 = vsel %vm935_vm5, %v1191_v32, %v1246_v1  ;;  %v1203_v0 = vadd.f32 %v1202_v39, %v1201_v48 }
 0x198   : > { %v1229_v42 = vmin.f32 %v1221_v54, 1.0  ;;  %v1230_v34 = vmin.f32 %v1222_v49, 1.0  ;;  %v1231_v25 = vmin.f32 %v1223_v62, 1.0  ;;  %v1248_v31 = vsel %vm937_vm6, %v1197_v23, %v1247_v58 }
 0x199   : > { %v1209_v27 = vmul.f32 %v2300_v3, %v1205_v20  ;;  %v1232_v37 = vmin.f32 %v1224_v21, 1.0  ;;  %v1233_v46 = vmin.f32 %v1225_v9, 1.0  ;;  %v1249_v29 = vsel %vm939_vm7, %v1203_v0, %v1248_v31 }
 0x19a   : > { %v1251_v61 = vmul.f32 %v1249_v29, %v1227_v59  ;;  %v1252_v38 = vmul.f32 %v1249_v29, %v1228_v50  ;;  %v1253_v12 = vmul.f32 %v1249_v29, %v1229_v42  ;;  %v1254_v16 = vmul.f32 %v1249_v29, %v1230_v34 }
 0x19b   : > { %v2204_v26 = vadd.f32 %v1209_v27, %v1207_v36  ;;  %v1255_v15 = vmul.f32 %v1249_v29, %v1231_v25  ;;  %v1234_v53 = vmin.f32 %v1226_v56, 1.0  ;;  %v1256_v8 = vmul.f32 %v1249_v29, %v1232_v37 }
 0x19c   : > { %v1257_v40 = vmul.f32 %v1249_v29, %v1233_v46  ;;  %v1259_v45 = vrot.slane %v1251_v61, 4  ;;  %v1265_v5 = vrot.slane %v1252_v38, 4  ;;  %v1271_v47 = vrot.slane %v1253_v12, 4 }
 0x19d   : > { %v1277_v63 = vrot.slane %v1254_v16, 4  ;;  %v1258_v30 = vmul.f32 %v1249_v29, %v1234_v53  ;;  %v1283_v48 = vrot.slane %v1255_v15, 4  ;;  %v1289_v10 = vrot.slane %v1256_v8, 4 }
 0x19e   : > { %v1295_v24 = vrot.slane %v1257_v40, 4  ;;  %v1260_v2 = vadd.f32 %v1259_v45, %v1251_v61  ;;  %v1266_v13 = vadd.f32 %v1265_v5, %v1252_v38  ;;  %v1272_v55 = vadd.f32 %v1271_v47, %v1253_v12 }
 0x19f   : > { %v1278_v54 = vadd.f32 %v1277_v63, %v1254_v16  ;;  %v1284_v59 = vadd.f32 %v1283_v48, %v1255_v15  ;;  %v1290_v49 = vadd.f32 %v1289_v10, %v1256_v8  ;;  %v1301_v28 = vrot.slane %v1258_v30, 4 }
 0x1a0   : > { %v1296_v51 = vadd.f32 %v1295_v24, %v1257_v40  ;;  %v1261_v18 = vrot.slane %v1260_v2, 2  ;;  %v1267_v14 = vrot.slane %v1266_v13, 2  ;;  %v1273_v39 = vrot.slane %v1272_v55, 2 }
 0x1a1   : > { %v1279_v19 = vrot.slane %v1278_v54, 2  ;;  %v1285_v7 = vrot.slane %v1284_v59, 2  ;;  %v1291_v62 = vrot.slane %v1290_v49, 2  ;;  %v1302_v20 = vadd.f32 %v1301_v28, %v1258_v30 }
 0x1a2   : > { %v1297_v21 = vrot.slane %v1296_v51, 2  ;;  %v1262_v6 = vadd.f32 %v1261_v18, %v1260_v2  ;;  %v1268_v32 = vadd.f32 %v1267_v14, %v1266_v13  ;;  %v1274_v9 = vadd.f32 %v1273_v39, %v1272_v55 }
 0x1a3   : > { %v1280_v50 = vadd.f32 %v1279_v19, %v1278_v54  ;;  %v1286_v1 = vadd.f32 %v1285_v7, %v1284_v59  ;;  %v1292_v23 = vadd.f32 %v1291_v62, %v1290_v49  ;;  %v1303_v36 = vrot.slane %v1302_v20, 2 }
 0x1a4   : > { %v1298_v56 = vadd.f32 %v1297_v21, %v1296_v51  ;;  %v1263_v3 = vrot.slane %v1262_v6, 1  ;;  %v1269_v27 = vrot.slane %v1268_v32, 1  ;;  %v1275_v58 = vrot.slane %v1274_v9, 1 }
 0x1a5   : > { %v1281_v0 = vrot.slane %v1280_v50, 1  ;;  %v1287_v42 = vrot.slane %v1286_v1, 1  ;;  %v1304_v34 = vadd.f32 %v1303_v36, %v1302_v20  ;;  %v1330_v25 = vmin.f32 %v1322_v33, 1.0 }
 0x1a6   : > { %v1323_v31 = vmax.f32 %v2074_v4, 0.0  ;;  %v1264_v37 = vadd.f32 %v1263_v3, %v1262_v6  ;;  %v1270_v46 = vadd.f32 %v1269_v27, %v1268_v32  ;;  %v1276_v29 = vadd.f32 %v1275_v58, %v1274_v9 }
 0x1a7   : > { %v1293_v61 = vrot.slane %v1292_v23, 1  ;;  %v1299_v38 = vrot.slane %v1298_v56, 1  ;;  %v1324_v12 = vmax.f32 %v2096_v22, 0.0  ;;  %v1328_v16 = vmax.f32 %v2131_v35, 0.0 }
 0x1a8   : > { %v1329_v15 = vmax.f32 %v2144_v11, 0.0  ;;  %v1282_v53 = vadd.f32 %v1281_v0, %v1280_v50  ;;  %v1305_v8 = vrot.slane %v1304_v34, 1  ;;  %v1346_v40 = vsel %vm927_vm1, %v1270_v46, %v1264_v37 }
 0x1a9   : > { %v1307_v45 = vmax.f32 %v1264_v37, 0.0  ;;  %v1288_v52 = vadd.f32 %v1287_v42, %v1286_v1  ;;  %v1347_v33 = vsel %vm929_vm2, %v1276_v29, %v1346_v40  ;;  %v1325_v4 = vmax.f32 %v2107_v43, 0.0 }
 0x1aa   : > { %v1326_v5 = vmax.f32 %v2113_v17, 0.0  ;;  %v1294_v47 = vadd.f32 %v1293_v61, %v1292_v23  ;;  %v1348_v63 = vsel %vm931_vm3, %v1282_v53, %v1347_v33  ;;  %v1327_v22 = vmax.f32 %v2119_v44, 0.0 }
 0x1ab   : > { %v1308_v35 = vmin.f32 %v1307_v45, 1.0  ;;  %v1300_v30 = vadd.f32 %v1299_v38, %v1298_v56  ;;  %v1349_v11 = vsel %vm933_vm4, %v1288_v52, %v1348_v63  ;;  %v1336_v48 = vmin.f32 %v1328_v16, 1.0 }
 0x1ac   : > { %v1337_v10 = vmin.f32 %v1329_v15, 1.0  ;;  %v1310_v24 = vmul.f32 %v2162_v41, %v2204_v26  ;;  %v1306_v2 = vadd.f32 %v1305_v8, %v1304_v34  ;;  %v1350_v13 = vsel %vm935_vm5, %v1294_v47, %v1349_v11 }
 0x1ad   : > { %v1312_v43 = vmul.f32 %v1311_v60, %v1308_v35  ;;  %v1351_v17 = vsel %vm937_vm6, %v1300_v30, %v1350_v13  ;;  %v1331_v55 = vmin.f32 %v1323_v31, 1.0  ;;  %v1332_v54 = vmin.f32 %v1324_v12, 1.0  ;;  %v1412_v35 = vld [vmem:[%s1895_s29 + $0x37] ss:$0 sm:$0xff] }
 0x1ae   : > { %v1333_v44 = vmin.f32 %v1325_v4, 1.0  ;;  %v1352_v59 = vsel %vm939_vm7, %v1306_v2, %v1351_v17  ;;  %v1334_v49 = vmin.f32 %v1326_v5, 1.0  ;;  %v1335_v51 = vmin.f32 %v1327_v22, 1.0 }
 0x1af   : > { %v2227_v28 = vadd.f32 %v1312_v43, %v1310_v24  ;;  %v1354_v18 = vmul.f32 %v1352_v59, %v1330_v25  ;;  %v1355_v14 = vmul.f32 %v1352_v59, %v1331_v55  ;;  %v1356_v26 = vmul.f32 %v1352_v59, %v1332_v54 }
 0x1b0   : > { %v1357_v39 = vmul.f32 %v1352_v59, %v1333_v44  ;;  %v1358_v19 = vmul.f32 %v1352_v59, %v1334_v49  ;;  %v1359_v7 = vmul.f32 %v1352_v59, %v1335_v51  ;;  %v1360_v62 = vmul.f32 %v1352_v59, %v1336_v48 }
 0x1b1   : > { %v1361_v41 = vmul.f32 %v1352_v59, %v1337_v10  ;;  %v1362_v60 = vrot.slane %v1354_v18, 4  ;;  %v1368_v21 = vrot.slane %v1355_v14, 4  ;;  %v1374_v20 = vrot.slane %v1356_v26, 4 }
 0x1b2   : > { %v1380_v6 = vrot.slane %v1357_v39, 4  ;;  %v1386_v32 = vrot.slane %v1358_v19, 4  ;;  %v1392_v9 = vrot.slane %v1359_v7, 4  ;;  %v1398_v50 = vrot.slane %v1360_v62, 4 }
 0x1b3   : > { %v1404_v1 = vrot.slane %v1361_v41, 4  ;;  %v1363_v23 = vadd.f32 %v1362_v60, %v1354_v18  ;;  %v1369_v56 = vadd.f32 %v1368_v21, %v1355_v14  ;;  %v1375_v36 = vadd.f32 %v1374_v20, %v1356_v26 }
 0x1b4   : > { %v1381_v3 = vadd.f32 %v1380_v6, %v1357_v39  ;;  %v1387_v27 = vadd.f32 %v1386_v32, %v1358_v19  ;;  %v1393_v58 = vadd.f32 %v1392_v9, %v1359_v7  ;;  %v1399_v0 = vadd.f32 %v1398_v50, %v1360_v62 }
 0x1b5   : > { %v1405_v42 = vadd.f32 %v1404_v1, %v1361_v41  ;;  %v1364_v34 = vrot.slane %v1363_v23, 2  ;;  %v1370_v25 = vrot.slane %v1369_v56, 2  ;;  %v1376_v31 = vrot.slane %v1375_v36, 2 }
 0x1b6   : > { %v1382_v37 = vrot.slane %v1381_v3, 2  ;;  %v1388_v46 = vrot.slane %v1387_v27, 2  ;;  %v1394_v29 = vrot.slane %v1393_v58, 2  ;;  %v1400_v61 = vrot.slane %v1399_v0, 2 }
 0x1b7   : > { %v1406_v38 = vrot.slane %v1405_v42, 2  ;;  %v1365_v12 = vadd.f32 %v1364_v34, %v1363_v23  ;;  %v1371_v16 = vadd.f32 %v1370_v25, %v1369_v56  ;;  %v1377_v15 = vadd.f32 %v1376_v31, %v1375_v36  ;;  %v1445_v23 = vld [vmem:[%s1895_s29 + $0x3f] ss:$0 sm:$0xff]  ;;  %s1452_s29 = scalar_lea.sflag [#allocation5], %s1891_s25 }
 0x1b8   : > { %v1383_v53 = vadd.f32 %v1382_v37, %v1381_v3  ;;  %v1389_v8 = vadd.f32 %v1388_v46, %v1387_v27  ;;  %v1395_v40 = vadd.f32 %v1394_v29, %v1393_v58  ;;  %v1401_v45 = vadd.f32 %v1400_v61, %v1399_v0 }
 0x1b9   : > { %v1407_v52 = vadd.f32 %v1406_v38, %v1405_v42  ;;  %v1366_v33 = vrot.slane %v1365_v12, 1  ;;  %v1372_v4 = vrot.slane %v1371_v16, 1  ;;  %v1378_v5 = vrot.slane %v1377_v15, 1 }
 0x1ba   : > { %v1384_v47 = vrot.slane %v1383_v53, 1  ;;  %v1390_v63 = vrot.slane %v1389_v8, 1  ;;  %v1396_v48 = vrot.slane %v1395_v40, 1  ;;  %v1414_v10 = vsub.f32 1.0, %v1412_v35 }
 0x1bb   : > { %v1367_v22 = vadd.f32 %v1366_v33, %v1365_v12  ;;  %v1373_v30 = vadd.f32 %v1372_v4, %v1371_v16  ;;  %v1379_v11 = vadd.f32 %v1378_v5, %v1377_v15  ;;  %v1402_v24 = vrot.slane %v1401_v45, 1 }
 0x1bc   : > { %v1385_v43 = vadd.f32 %v1384_v47, %v1383_v53  ;;  %v1408_v17 = vrot.slane %v1407_v52, 1  ;;  %v1418_v55 = vmax.f32 %v2070_v57, 0.0  ;;  %v1391_v44 = vadd.f32 %v1390_v63, %v1389_v8 }
 0x1bd   : > { %v1410_v2 = vmax.f32 %v1367_v22, 0.0  ;;  %v1428_v13 = vsel %vm927_vm1, %v1373_v30, %v1367_v22  ;;  %v1397_v51 = vadd.f32 %v1396_v48, %v1395_v40  ;;  %v1403_v14 = vadd.f32 %v1402_v24, %v1401_v45 }
 0x1be   : > { %v1429_v54 = vsel %vm929_vm2, %v1379_v11, %v1428_v13  ;;  %v1409_v19 = vadd.f32 %v1408_v17, %v1407_v52  ;;  %v1413_v7 = vmul.f32 %v1412_v35, %v2227_v28  ;;  %v1419_v62 = vmin.f32 %v1418_v55, 1.0 }
 0x1bf   : > { %v1411_v59 = vmin.f32 %v1410_v2, 1.0  ;;  %v1430_v49 = vsel %vm931_vm3, %v1385_v43, %v1429_v54  ;;  %v1447_v28 = vsub.f32 1.0, %v1445_v23 }
 0x1c0   : > { %v1431_v18 = vsel %vm933_vm4, %v1391_v44, %v1430_v49 }
 0x1c1   : > { %v1415_v26 = vmul.f32 %v1414_v10, %v1411_v59  ;;  %v1432_v39 = vsel %vm935_vm5, %v1397_v51, %v1431_v18 }
 0x1c2   : > { %v1433_v57 = vsel %vm937_vm6, %v1403_v14, %v1432_v39 }
 0x1c3   : > { %v1434_v41 = vsel %vm939_vm7, %v1409_v19, %v1433_v57  ;;  %v1416_v60 = vadd.f32 %v1415_v26, %v1413_v7 }
 0x1c4   : > { %v1436_v21 = vmul.f32 %v1434_v41, %v1419_v62 }
 0x1c5   : > { %v1446_v3 = vmul.f32 %v1445_v23, %v1416_v60 }
 0x1c6   : > { %v1437_v20 = vrot.slane %v1436_v21, 4 }
 0x1c8   : > { %v1438_v6 = vadd.f32 %v1437_v20, %v1436_v21 }
 0x1ca   : > { %v1439_v32 = vrot.slane %v1438_v6, 2 }
 0x1cc   : > { %v1440_v9 = vadd.f32 %v1439_v32, %v1438_v6 }
 0x1ce   : > { %v1441_v50 = vrot.slane %v1440_v9, 1 }
 0x1d0   : > { %v1442_v1 = vadd.f32 %v1441_v50, %v1440_v9 }
 0x1d2   : > { %v1443_v56 = vmax.f32 %v1442_v1, 0.0 }
 0x1d4   : > { %v1444_v36 = vmin.f32 %v1443_v56, 1.0 }
 0x1d6   : > { %v1448_v27 = vmul.f32 %v1447_v28, %v1444_v36 }
 0x1d8   : > { %v1449_v58 = vadd.f32 %v1448_v27, %v1446_v3 }
 0x1da   : > { %1450 = vst [vmem:[%s158_s20] sm:$0x1] %v1449_v58 }
 0x1db   : > { %1713 = shalt.err (!%p1710_p4)
}
 0x1dc   : > { %s1714_s25 = scalar_lea.hbm %s2245_s6, 16  ;;  %s1718_s19 = scalar_lea.hbm %s2291_s2, 32 }
 0x1dd   : > { %p1715_p5 = scmp.ne.s32.totalorder %s2245_s6, %s1714_s25  ;;  %p1719_p0 = scmp.lt.u32.totalorder %s2245_s6, %s2291_s2 }
 0x1de   : > { %p1720_p1 = scmp.lt.u32.totalorder %s1718_s19, %s1714_s25  ;;  %p1722_p6 = scmp.lt.u32.totalorder %s1714_s25, %s2245_s6 }
 0x1df   : > { %p1716_p8 = pnand %p1715_p5, %p2301_p11 }
 0x1e0   : > { %p1721_p3 = por %p1720_p1, %p1719_p0 }
 0x1e1   : > { %p1717_p9 = pneg %p1716_p8 }
 0x1e2   : > { %p1723_p12 = por %p1722_p6, %p1721_p3 }
 0x1e4   : > { %p1724_p13 = pnand %p1723_p12, %p1717_p9 }
 0x1e6   : > { %1727 = shalt.err (!%p1724_p13)
}
 0x1e7   : > { %1589 = dma.vmem_to_hbm [thread:$0]  (%p2301_p11), %s2247_s3, 16, %s2245_s6, %s1452_s29  }
 0x1e8 PF: > { %s1476_s26 = sand.u32 1, %s1754_s9   ;;  %p2302_p7 = scmp.ne.s32.totalorder %s2296_s22, 0 }
 0x1e9   : > { %p2303_p10 = scmp.ge.s32.totalorder %s1766_s12, 2  ;;  %s1477_s27 = scalar_lea.sflag [#allocation5], %s1476_s26 }
 0x1eb   : > { %p1596_p2 = pnand %p2303_p10, %p2302_p7 }
 0x1ed   : > { %1749 = dma.done.wait (!%p1596_p2), %s1477_s27, 16  }
 0x1ee   : > { %1751 = vsyncadd (!%p1596_p2), %s1477_s27, 4294967280  ;;  %p15_p4 = scmp.ge.s32.totalorder %s1811_s15, 4   ;;  %s2304_s9 = smov %s1758_s10 }
 0x1ef   : > { %s2305_s10 = smov %s1762_s11  ;;  %s2306_s11 = smov %s1823_s18 }
 0x1f0   : > { %s2307_s12 = smov %s1811_s15  ;;  %17 = sbr.rel (!%p15_p4) target bundleno = 5 (0x5), region = 73 }
 0x1f7   :  { %1481 = vsyncpa [#allocation4], 1 }
 0x1f8   :  { %1483 = vsyncpa [#allocation4 + $0x1], 1 }
 0x1f9   :  { %1484 = vsyncpa [#allocation5], 1 }
 0x1fa   :  { %1486 = vsyncpa [#allocation5 + $0x1], 1 }

</bundles_post_ra>
